<compile_context>
chip_gen: v7x
topology: tpu7x:2x2x1
jax: 0.10.0
libtpu: 0.0.40
codegen_flags: <defaults>
</compile_context>

<pallas_src>
import functools

import jax
import jax.numpy as jnp
from jax.experimental import pallas as pl
from jax.experimental.pallas import tpu as pltpu


def _round_up(x, m):
    return (x + m - 1) // m * m


def _vmem_capacity_bytes():
    try:
        info = pltpu.get_tpu_info()
        return int(getattr(info, "vmem_capacity_bytes", 64 * 1024 * 1024))
    except Exception:
        return 64 * 1024 * 1024  # conservative (v7x-sized) fallback


_VMEM_CAP = _vmem_capacity_bytes()
_BIG_VMEM = _VMEM_CAP >= 100 * 1024 * 1024               # v5e / v6e (128 MiB physical)
_VMEM_LIMIT = (96 if _BIG_VMEM else 48) * 1024 * 1024     # 48 MiB cap keeps v7x (64 MiB) safe
_RESIDENT_W_BYTES = (16 if _BIG_VMEM else 4) * 1024 * 1024  # weight kept VMEM-resident if <= this
_TK_MULTI = 2304                                           # K tile when not weight-resident


# ----------------------------------------------------------------------------
# Pallas matmul kernels (bf16 MXU, f32 accumulation, fused bias/residual/ReLU)
# ----------------------------------------------------------------------------
def _mm_single_kernel(*refs, relu, has_residual):
    """Single-K-tile matmul: no accumulator scratch, one-shot epilogue + store."""
    if has_residual:
        x_ref, w_ref, b_ref, r_ref, o_ref = refs
    else:
        x_ref, w_ref, b_ref, o_ref = refs
        r_ref = None
    y = jnp.dot(x_ref[...], w_ref[...], preferred_element_type=jnp.float32)
    y = y + b_ref[...]
    if has_residual:
        y = y + r_ref[...].astype(jnp.float32)
    if relu:
        y = jnp.maximum(y, 0.0)
    o_ref[...] = y.astype(o_ref.dtype)


def _mm_acc_kernel(*refs, relu, has_residual):
    """Multi-K-tile matmul with f32 VMEM accumulator and fused epilogue on the last k."""
    if has_residual:
        x_ref, w_ref, b_ref, r_ref, o_ref, acc_ref = refs
    else:
        x_ref, w_ref, b_ref, o_ref, acc_ref = refs
        r_ref = None
    k = pl.program_id(1)

    @pl.when(k == 0)
    def _():
        acc_ref[...] = jnp.zeros_like(acc_ref)

    acc_ref[...] += jnp.dot(x_ref[...], w_ref[...],
                            preferred_element_type=jnp.float32)

    @pl.when(k == pl.num_programs(1) - 1)
    def _():
        y = acc_ref[...] + b_ref[...]
        if has_residual:
            y = y + r_ref[...].astype(jnp.float32)
        if relu:
            y = jnp.maximum(y, 0.0)
        o_ref[...] = y.astype(o_ref.dtype)


def matmul_fused(x, w, bias, *, relu, residual=None, out_dtype=jnp.bfloat16):
    """out = [relu]( x @ w + bias [+ residual] )   (frozen-BN scale pre-folded into w).

    x: (M, Kp) float (cast to bf16), w: (Kp, N) bf16, bias: (1, N) f32,
    residual: (M, N) or None.  Returns (M, N) in out_dtype.
    """
    M, Kp = x.shape
    Kp2, N = w.shape
    assert Kp == Kp2

    TM = min(512, _round_up(M, 16))      # bf16 sublane tile is (16,128)
    Mp = _round_up(M, TM)

    x = x.astype(jnp.bfloat16)
    if Mp != M:
        x = jnp.pad(x, ((0, Mp - M), (0, 0)))

    has_res = residual is not None
    if has_res:
        r = residual.astype(jnp.bfloat16)
        if Mp != M:
            r = jnp.pad(r, ((0, Mp - M), (0, 0)))

    w_bytes = Kp * N * 2
    single_k = (w_bytes <= _RESIDENT_W_BYTES) or (Kp % _TK_MULTI != 0)

    if single_k:
        # whole K in one step; weight block index is constant -> stays VMEM-resident.
        TK = Kp
        grid = (Mp // TM,)
        inputs = [x, w, bias]
        in_specs = [pl.BlockSpec((TM, TK), lambda i: (i, 0)),
                    pl.BlockSpec((TK, N), lambda i: (0, 0)),
                    pl.BlockSpec((1, N), lambda i: (0, 0))]
        if has_res:
            inputs.append(r)
            in_specs.append(pl.BlockSpec((TM, N), lambda i: (i, 0)))
        out_spec = pl.BlockSpec((TM, N), lambda i: (i, 0))
        kernel = functools.partial(_mm_single_kernel, relu=relu, has_residual=has_res)
        scratch = []
        dim_sem = ("parallel",)
    else:
        TK = _TK_MULTI
        assert Kp % TK == 0
        grid = (Mp // TM, Kp // TK)
        inputs = [x, w, bias]
        in_specs = [pl.BlockSpec((TM, TK), lambda i, k: (i, k)),
                    pl.BlockSpec((TK, N), lambda i, k: (k, 0)),
                    pl.BlockSpec((1, N), lambda i, k: (0, 0))]
        if has_res:
            inputs.append(r)
            in_specs.append(pl.BlockSpec((TM, N), lambda i, k: (i, 0)))
        out_spec = pl.BlockSpec((TM, N), lambda i, k: (i, 0))
        kernel = functools.partial(_mm_acc_kernel, relu=relu, has_residual=has_res)
        scratch = [pltpu.VMEM((TM, N), jnp.float32)]
        dim_sem = ("parallel", "arbitrary")

    out = pl.pallas_call(
        kernel,
        out_shape=jax.ShapeDtypeStruct((Mp, N), out_dtype),
        grid_spec=pltpu.PrefetchScalarGridSpec(
            num_scalar_prefetch=0,
            grid=grid,
            in_specs=in_specs,
            out_specs=out_spec,
            scratch_shapes=scratch,
        ),
        compiler_params=pltpu.CompilerParams(
            dimension_semantics=dim_sem,
            vmem_limit_bytes=_VMEM_LIMIT,
        ),
    )(*inputs)

    if Mp != M:
        out = out[:M]          # row trim only; N is emitted at its true width
    return out


# ----------------------------------------------------------------------------
# Fused AdaptiveAvgPool3d((1,1,1)) + Linear(512,128) + ReLU head
# ----------------------------------------------------------------------------
def _pool_fc_kernel(x_ref, w_ref, b_ref, o_ref, *, inv_l):
    # x_ref: (1, L, C) bf16; w: (C, F) f32; b: (1, F) f32; o: (1, F) f32
    pooled = jnp.sum(x_ref[...].astype(jnp.float32), axis=1) * inv_l        # (1, C)
    y = jnp.dot(pooled, w_ref[...], preferred_element_type=jnp.float32) + b_ref[...]
    o_ref[...] = jnp.maximum(y, 0.0)


def pool_fc_head(x, fc_w, fc_b):
    """x: (B, L, C) -> ReLU( mean_L(x) @ fc_w + fc_b )  in f32."""
    B, L, C = x.shape
    F = fc_w.shape[1]
    return pl.pallas_call(
        functools.partial(_pool_fc_kernel, inv_l=1.0 / float(L)),
        out_shape=jax.ShapeDtypeStruct((B, F), jnp.float32),
        grid_spec=pltpu.PrefetchScalarGridSpec(
            num_scalar_prefetch=0,
            grid=(B,),
            in_specs=[pl.BlockSpec((1, L, C), lambda b: (b, 0, 0)),
                      pl.BlockSpec((C, F), lambda b: (0, 0)),
                      pl.BlockSpec((1, F), lambda b: (0, 0))],
            out_specs=pl.BlockSpec((1, F), lambda b: (b, 0)),
        ),
        compiler_params=pltpu.CompilerParams(
            dimension_semantics=("parallel",),
            vmem_limit_bytes=_VMEM_LIMIT,
        ),
    )(x, fc_w, fc_b)


# ----------------------------------------------------------------------------
# Conv3d (im2col glue, bf16) + folded BN / residual / ReLU via the Pallas matmul
# ----------------------------------------------------------------------------
def im2col_3d(x, ksize, stride, padding, k_pad=0):
    """x: (B,T,H,W,C) -> (B*To*Ho*Wo, kt*kh*kw*C + k_pad) bf16 columns (dt,dh,dw,C order)."""
    kt, kh, kw = ksize
    st, sh, sw = stride
    pt, ph, pw = padding
    if pt or ph or pw:
        x = jnp.pad(x, ((0, 0), (pt, pt), (ph, ph), (pw, pw), (0, 0)))
    B, Tp, Hp, Wp, C = x.shape
    To = (Tp - kt) // st + 1
    Ho = (Hp - kh) // sh + 1
    Wo = (Wp - kw) // sw + 1
    cols = []
    for dt in range(kt):
        for dh in range(kh):
            for dw in range(kw):
                cols.append(x[:, dt:dt + st * To:st,
                              dh:dh + sh * Ho:sh,
                              dw:dw + sw * Wo:sw, :])
    if k_pad:
        cols.append(jnp.zeros((B, To, Ho, Wo, k_pad), x.dtype))
    cols = jnp.concatenate(cols, axis=-1)
    return cols.reshape(B * To * Ho * Wo, kt * kh * kw * C + k_pad), (B, To, Ho, Wo)


def conv3d_bn(x, p, stride, padding, relu, residual=None):
    """Conv3d(bias=False) + frozen BatchNorm3d (scale folded into w) (+residual) (+ReLU)."""
    cols, (B, To, Ho, Wo) = im2col_3d(x, p["ksize"], stride, padding,
                                      k_pad=p["w2d"].shape[0] - p["k_true"])
    y = matmul_fused(cols, p["w2d"], p["bias_p"], relu=relu, residual=residual,
                     out_dtype=jnp.bfloat16)
    return y.reshape(B, To, Ho, Wo, p["n_out"])


def basic_block(x, p, stride):
    identity = x
    out = conv3d_bn(x, p["conv1"], stride, (1, 1, 1), relu=True)
    if "downsample" in p:
        identity = conv3d_bn(identity, p["downsample"], stride, (0, 0, 0), relu=False)
    B, T, H, W, C = out.shape
    res = identity.reshape(B * T * H * W, C)
    # residual add + final ReLU are fused into conv2's matmul epilogue
    out = conv3d_bn(out, p["conv2"], (1, 1, 1), (1, 1, 1), relu=True, residual=res)
    return out


# ----------------------------------------------------------------------------
# Deterministic parameter init (r3d_18 shapes; synthetic weights, not a checkpoint)
# Weights stored pre-laid-out: (Kp, n_out) bf16 with frozen-BN scale folded in,
# bias (1, n_out) f32.
# ----------------------------------------------------------------------------
def _conv_bn_params(key, cin, cout, ksize):
    kt, kh, kw = ksize
    kw_, kg, kb, km, kv = jax.random.split(key, 5)
    fan_in = cin * kt * kh * kw
    w = jax.random.normal(kw_, (kt, kh, kw, cin, cout), jnp.float32) / jnp.sqrt(fan_in)
    gamma = 1.0 + 0.1 * jax.random.normal(kg, (cout,), jnp.float32)
    beta = 0.1 * jax.random.normal(kb, (cout,), jnp.float32)
    mean = 0.1 * jax.random.normal(km, (cout,), jnp.float32)
    var = 1.0 + 0.1 * jax.random.uniform(kv, (cout,), jnp.float32)
    eps = 1e-5
    scale = gamma / jnp.sqrt(var + eps)      # fold eval-mode BN
    bias = beta - mean * scale

    K = kt * kh * kw * cin
    Kp = _round_up(K, 128)
    w2d = (w.reshape(K, cout) * scale[None, :]).astype(jnp.bfloat16)   # BN scale folded
    if Kp != K:
        w2d = jnp.pad(w2d, ((0, Kp - K), (0, 0)))
    return {"w2d": w2d, "bias_p": bias.reshape(1, cout),
            "ksize": ksize, "k_true": K, "n_out": cout}


def init_params(key):
    keys = iter(jax.random.split(key, 64))
    params = {"stem": _conv_bn_params(next(keys), 3, 64, (3, 7, 7))}
    chans = [64, 64, 128, 256, 512]
    for li in range(4):
        cin, cout = chans[li], chans[li + 1]
        blocks = []
        for bi in range(2):
            in_c = cin if bi == 0 else cout
            b = {
                "conv1": _conv_bn_params(next(keys), in_c, cout, (3, 3, 3)),
                "conv2": _conv_bn_params(next(keys), cout, cout, (3, 3, 3)),
            }
            if bi == 0 and li > 0:           # stride-2 block needs 1x1x1 downsample
                b["downsample"] = _conv_bn_params(next(keys), in_c, cout, (1, 1, 1))
            blocks.append(b)
        params[f"layer{li + 1}"] = blocks

    # replaced head: nn.Linear(512, 128) -> ReLU -> Dropout(0.2); kept in f32 for precision.
    kfw, kfb = jax.random.split(next(keys))
    fc_w = jax.random.normal(kfw, (512, 128), jnp.float32) / jnp.sqrt(512.0)
    fc_b = 0.01 * jax.random.normal(kfb, (128,), jnp.float32)
    params["fc"] = {"w": fc_w, "b": fc_b.reshape(1, 128)}
    return params


# ----------------------------------------------------------------------------
# Forward pass (matches VideoEncoder.forward)
# ----------------------------------------------------------------------------
def video_encoder_forward(x, params):
    # x: (B, T, C, H, W) exactly like the PyTorch forward input.
    # x.transpose(1,2) -> NCDHW; kernels use channels-last NDHWC = (B, T, H, W, C).
    x = jnp.transpose(x, (0, 1, 3, 4, 2)).astype(jnp.bfloat16)

    # stem: Conv3d(3,64,(3,7,7),stride=(1,2,2),pad=(1,3,3)) + BN + ReLU
    x = conv3d_bn(x, params["stem"], (1, 2, 2), (1, 3, 3), relu=True)

    strides = [(1, 1, 1), (2, 2, 2), (2, 2, 2), (2, 2, 2)]
    for li in range(4):
        for bi, blk in enumerate(params[f"layer{li + 1}"]):
            s = strides[li] if bi == 0 else (1, 1, 1)
            x = basic_block(x, blk, s)

    B, T, H, W, C = x.shape
    # AdaptiveAvgPool3d((1,1,1)) + Linear(512,128) + ReLU, fused into one kernel.
    x = pool_fc_head(x.reshape(B, T * H * W, C), params["fc"]["w"], params["fc"]["b"])
    # TODO(synk): Dropout(0.2) is treated as eval-mode identity (frozen pretrained backbone).
    return x


if __name__ == "__main__":
    key = jax.random.PRNGKey(0)
    kx, kp = jax.random.split(key)
    # small shapes implied by the forward: batch=2, frames=4, RGB video 16x16
    x = jax.random.normal(kx, (2, 4, 3, 16, 16), jnp.float32)
    params = init_params(kp)
    out = video_encoder_forward(x, params)
    out = jax.block_until_ready(out)
    assert out.shape == (2, 128)
    assert bool(jnp.all(out >= 0.0))   # ReLU head
    print("KERNEL_OK")
</pallas_src>

<mosaic_0001>
module attributes {stable_mosaic.version = 11 : i64} {
  func.func @_mm_single_kernel(%arg0: i32, %arg1: memref<512x512xbf16, #tpu.memory_space<vmem>>, %arg2: memref<512x64xbf16, #tpu.memory_space<vmem>>, %arg3: memref<1x64xf32, #tpu.memory_space<vmem>>, %arg4: memref<512x64xbf16, #tpu.memory_space<vmem>>) attributes {dimension_semantics = [#tpu.dimension_semantics<parallel>], iteration_bounds = array<i64: 1>, scalar_prefetch = 0 : i64, scratch_operands = 0 : i64, tpu.core_type = #tpu.core_type<tc>, window_params = [{transform_indices = @transform_0, window_bounds = array<i64: 512, 512>}, {pipeline_mode = #tpu.pipeline_mode<synchronous>, transform_indices = @transform_1, window_bounds = array<i64: 512, 64>}, {pipeline_mode = #tpu.pipeline_mode<synchronous>, transform_indices = @transform_2, window_bounds = array<i64: 1, 64>}, {transform_indices = @transform_3, window_bounds = array<i64: 512, 64>}]} {
    %c0 = arith.constant 0 : index
    %c0_0 = arith.constant 0 : index
    %0 = vector.load %arg1[%c0, %c0_0] : memref<512x512xbf16, #tpu.memory_space<vmem>>, vector<512x512xbf16>
    %c0_1 = arith.constant 0 : index
    %c0_2 = arith.constant 0 : index
    %1 = vector.load %arg2[%c0_1, %c0_2] : memref<512x64xbf16, #tpu.memory_space<vmem>>, vector<512x64xbf16>
    %cst = arith.constant dense<0.000000e+00> : vector<512x64xf32>
    %2 = tpu.matmul %0, %1, %cst {dimension_numbers = #tpu.dot_dimension_numbers<[1], [0], [0], [1], [0, 0, 1, 1], [], []>} : vector<512x512xbf16>, vector<512x64xbf16>, vector<512x64xf32> -> vector<512x64xf32>
    %c0_3 = arith.constant 0 : index
    %c0_4 = arith.constant 0 : index
    %3 = vector.load %arg3[%c0_3, %c0_4] : memref<1x64xf32, #tpu.memory_space<vmem>>, vector<1x64xf32>
    %4 = vector.broadcast %3 : vector<1x64xf32> to vector<512x64xf32>
    %5 = arith.addf %2, %4 : vector<512x64xf32>
    %cst_5 = arith.constant 0.000000e+00 : f32
    %6 = vector.broadcast %cst_5 : f32 to vector<512x64xf32>
    %7 = arith.maximumf %5, %6 : vector<512x64xf32>
    %8 = arith.truncf %7 : vector<512x64xf32> to vector<512x64xbf16>
    %c0_6 = arith.constant 0 : index
    %c0_7 = arith.constant 0 : index
    %9 = vector.load %arg4[%c0_6, %c0_7] : memref<512x64xbf16, #tpu.memory_space<vmem>>, vector<512x64xbf16>
    tpu.vector_store %arg4[%c0_6, %c0_7], %8 {strides = array<i32>} : memref<512x64xbf16, #tpu.memory_space<vmem>>, vector<512x64xbf16>,
    return
  }
  func.func @transform_0(%arg0: i32) -> (i32, i32) {
    %c0_i32 = arith.constant 0 : i32
    %c0_i32_0 = arith.constant 0 : i32
    return %arg0, %c0_i32 : i32, i32
  }
  func.func @transform_1(%arg0: i32) -> (i32, i32) {
    %c0_i32 = arith.constant 0 : i32
    %c0_i32_0 = arith.constant 0 : i32
    %c0_i32_1 = arith.constant 0 : i32
    return %c0_i32, %c0_i32_0 : i32, i32
  }
  func.func @transform_2(%arg0: i32) -> (i32, i32) {
    %c0_i32 = arith.constant 0 : i32
    %c0_i32_0 = arith.constant 0 : i32
    %c0_i32_1 = arith.constant 0 : i32
    return %c0_i32, %c0_i32_0 : i32, i32
  }
  func.func @transform_3(%arg0: i32) -> (i32, i32) {
    %c0_i32 = arith.constant 0 : i32
    %c0_i32_0 = arith.constant 0 : i32
    return %arg0, %c0_i32 : i32, i32
  }
}

</mosaic_0001>

<bundles_post_ra>
// kernel: tpu_custom_call.1
= control target key start
LH: loop header
LB: loop body
LE: loop exit
PB: predicated region body
PF: predicated region fallthrough
CT: control target
= control target key end

     0   :  { %8 = vsyncpa [#allocation3], 0  ;;  %s2698_s12 = smov [#allocation2]   ;;  %s3192_s0 = inlined_call_operand.hbm [shape: bf16[512,512], index: 0, kind: input, shape index: {}]   ;;  %s3193_s1 = inlined_call_operand.vmem [shape: bf16[512,64], index: 1, kind: input, shape index: {}]   ;;  %s3194_s2 = inlined_call_operand.vmem [shape: f32[1,64], index: 2, kind: input, shape index: {}]   ;;  %s3195_s3 = inlined_call_operand.vmem [shape: bf16[512,64], index: 3, kind: output, shape index: {}]  }
   0x1   :  { %s14_s13 = sshll.u32 %s2698_s12, 4  ;;  %s2674_s16 = scalar_lea.hbm %s3192_s0, 16384  ;;  %s15_s13 = int_to_ptr.vmem [resolvable:$true] %s14_s13 }
   0x2   :  { %p2675_p0 = scmp.ne.s32.totalorder %s3192_s0, %s2674_s16  ;;  %p2678_p1 = scmp.lt.u32.totalorder %s2674_s16, %s3192_s0 }
   0x4   :  { %p2680_p2 = pnand %p2678_p1, %p2675_p0 }
   0x6   :  { %2683 = shalt.err (!%p2680_p2)
}
   0x7   :  { %s2684_s21 = scalar_lea.vmem %s15_s13, 16384  ;;  %p2689_p4 = scmp.lt.s32.totalorder %s15_s13, %s15_s13 }
   0x8   :  { %p2685_p3 = scmp.ne.s32.totalorder %s15_s13, %s2684_s21  ;;  %p2690_p5 = scmp.lt.s32.totalorder %s2684_s21, %s2684_s21 }
   0xa   :  { %p2691_p6 = por %p2690_p5, %p2689_p4 }
   0xc   :  { %p2692_p7 = pnand %p2691_p6, %p2685_p3 }
   0xe   :  { %2695 = shalt.err (!%p2692_p7)
}
   0xf   :  { %s2699_s22 = smov 256   ;;  %s2700_s23 = smov 16  }
  0x10   :  { %20 = dma.hbm_to_vmem [thread:$0]  %s3192_s0, 16384, %s15_s13, [#allocation3], %s2699_s22, %s2699_s22, %s2700_s23  }
  0x11   :  { %2696 = dma.done.wait [#allocation3], 16384  }
  0x12   :  { %2697 = vsyncadd [#allocation3], 4294950912  ;;  %v2701_v0 = vmov 0   ;;  %v2449_v1 = vld [vmem:[%s3193_s1] sm:$0xff]   ;;  %v2451_v3 = vld [vmem:[%s3193_s1 + $0x8] sm:$0xff]   ;;  %vm1958_vm0 = vcmask 519168  }
  0x13   :  { %1060 = vmatprep.subr.bf16.mxu1 %v2701_v0  ;;  %1349 = vmatprep.subr.bf16.mxu0 %v2701_v0  ;;  %v2450_v2 = vld [vmem:[%s3193_s1 + $0x80] sm:$0xff]   ;;  %v2452_v4 = vld [vmem:[%s3193_s1 + $0x88] sm:$0xff]   ;;  %v2453_v5 = vld [vmem:[%s3193_s1 + $0x10] sm:$0xff]  }
  0x14   :  { %1061 = vmatpush1.bf16.msra.mxu1 %v2449_v1  ;;  %1350 = vmatpush1.bf16.msra.mxu0 %v2450_v2  ;;  %v2454_v6 = vld [vmem:[%s3193_s1 + $0x90] sm:$0xff]   ;;  %v2455_v7 = vld [vmem:[%s3193_s1 + $0x18] sm:$0xff]   ;;  %v2457_v9 = vld [vmem:[%s3193_s1 + $0x20] sm:$0xff]  }
  0x15   :  { %1062 = vmatprep.subr.bf16.mxu1 %v2701_v0  ;;  %1351 = vmatprep.subr.bf16.mxu0 %v2701_v0  ;;  %v2456_v8 = vld [vmem:[%s3193_s1 + $0x98] sm:$0xff]   ;;  %v2458_v10 = vld [vmem:[%s3193_s1 + $0xa0] sm:$0xff]   ;;  %v2459_v11 = vld [vmem:[%s3193_s1 + $0x28] sm:$0xff]  }
  0x16   :  { %v2460_v12 = vld [vmem:[%s3193_s1 + $0xa8] sm:$0xff]   ;;  %v2461_v13 = vld [vmem:[%s3193_s1 + $0x30] sm:$0xff]   ;;  %v2463_v15 = vld [vmem:[%s3193_s1 + $0x38] sm:$0xff]  }
  0x17   :  { %v2462_v14 = vld [vmem:[%s3193_s1 + $0xb0] sm:$0xff]   ;;  %v2464_v16 = vld [vmem:[%s3193_s1 + $0xb8] sm:$0xff]   ;;  %v2465_v17 = vld [vmem:[%s3193_s1 + $0x40] sm:$0xff]  }
  0x18   :  { %1063 = vmatpush1.bf16.msra.mxu1 %v2451_v3  ;;  %1352 = vmatpush1.bf16.msra.mxu0 %v2452_v4  ;;  %v2466_v18 = vld [vmem:[%s3193_s1 + $0xc0] sm:$0xff]   ;;  %v2467_v20 = vld [vmem:[%s3193_s1 + $0x48] sm:$0xff]   ;;  %v2469_v23 = vld [vmem:[%s3193_s1 + $0x50] sm:$0xff]  }
  0x19   :  { %1064 = vmatprep.subr.bf16.mxu1 %v2701_v0  ;;  %1353 = vmatprep.subr.bf16.mxu0 %v2701_v0  ;;  %v2483_v19 = vld [vmem:[#allocation2 + $0x4] ss:$16 sps:$4 sm:$0xff]   ;;  %v2486_v21 = vld [vmem:[#allocation2 + $0xc] ss:$16 sps:$4 sm:$0xff]   ;;  %v2481_v35 = vld [vmem:[#allocation2] ss:$16 sps:$4 sm:$0xff]  }
  0x1a   :  { %v2468_v22 = vld [vmem:[%s3193_s1 + $0xc8] sm:$0xff]   ;;  %1092 = vmatprep.mubr.bf16.mxu1 %v2483_v19  ;;  %1381 = vmatprep.mubr.bf16.mxu0 %v2486_v21  ;;  %v2470_v24 = vld [vmem:[%s3193_s1 + $0xd0] sm:$0xff]   ;;  %v2471_v25 = vld [vmem:[%s3193_s1 + $0x58] sm:$0xff]  }
  0x1b   :  { %v2472_v26 = vld [vmem:[%s3193_s1 + $0xd8] sm:$0xff]   ;;  %v2473_v27 = vld [vmem:[%s3193_s1 + $0x60] sm:$0xff]   ;;  %v2475_v29 = vld [vmem:[%s3193_s1 + $0x68] sm:$0xff]  }
  0x1c   :  { %1065 = vmatpush1.bf16.msra.mxu1 %v2453_v5  ;;  %1354 = vmatpush1.bf16.msra.mxu0 %v2454_v6  ;;  %v2474_v28 = vld [vmem:[%s3193_s1 + $0xe0] sm:$0xff]   ;;  %v2476_v30 = vld [vmem:[%s3193_s1 + $0xe8] sm:$0xff]   ;;  %v2477_v31 = vld [vmem:[%s3193_s1 + $0x70] sm:$0xff]  }
  0x1d   :  { %1066 = vmatprep.subr.bf16.mxu1 %v2701_v0  ;;  %1355 = vmatprep.subr.bf16.mxu0 %v2701_v0  ;;  %v2478_v32 = vld [vmem:[%s3193_s1 + $0xf0] sm:$0xff]   ;;  %v2479_v33 = vld [vmem:[%s3193_s1 + $0x78] sm:$0xff]  }
  0x1e   :  { %v2480_v34 = vld [vmem:[%s3193_s1 + $0xf8] sm:$0xff]   ;;  %v2487_v37 = vld [vmem:[#allocation2 + $0x24] ss:$16 sps:$4 sm:$0xff]   ;;  %v2491_v39 = vld [vmem:[#allocation2 + $0x20] ss:$16 sps:$4 sm:$0xff]  }
  0x1f   :  { %v2484_v36 = vld [vmem:[#allocation2 + $0x8] ss:$16 sps:$4 sm:$0xff]   ;;  %v2489_v38 = vld [vmem:[#allocation2 + $0x2c] ss:$16 sps:$4 sm:$0xff]   ;;  %v2493_v41 = vld [vmem:[#allocation2 + $0x44] ss:$16 sps:$4 sm:$0xff]  }
  0x20   :  { %1067 = vmatpush1.bf16.msra.mxu1 %v2455_v7  ;;  %1356 = vmatpush1.bf16.msra.mxu0 %v2456_v8  ;;  %v2492_v40 = vld [vmem:[#allocation2 + $0x28] ss:$16 sps:$4 sm:$0xff]   ;;  %v2495_v42 = vld [vmem:[#allocation2 + $0x4c] ss:$16 sps:$4 sm:$0xff]   ;;  %v2497_v43 = vld [vmem:[#allocation2 + $0x40] ss:$16 sps:$4 sm:$0xff]  }
  0x21   :  { %1068 = vmatprep.subr.bf16.mxu1 %v2701_v0  ;;  %1357 = vmatprep.subr.bf16.mxu0 %v2701_v0  ;;  %v2498_v44 = vld [vmem:[#allocation2 + $0x48] ss:$16 sps:$4 sm:$0xff]   ;;  %v2499_v45 = vld [vmem:[#allocation2 + $0x64] ss:$16 sps:$4 sm:$0xff]   ;;  %v2501_v46 = vld [vmem:[#allocation2 + $0x6c] ss:$16 sps:$4 sm:$0xff]  }
  0x22   :  { %v2503_v47 = vld [vmem:[#allocation2 + $0x60] ss:$16 sps:$4 sm:$0xff]   ;;  %v2504_v48 = vld [vmem:[#allocation2 + $0x68] ss:$16 sps:$4 sm:$0xff]   ;;  %v2505_v49 = vld [vmem:[#allocation2 + $0x84] ss:$16 sps:$4 sm:$0xff]  }
  0x23   :  { %v2507_v50 = vld [vmem:[#allocation2 + $0x8c] ss:$16 sps:$4 sm:$0xff]   ;;  %v2509_v51 = vld [vmem:[#allocation2 + $0x80] ss:$16 sps:$4 sm:$0xff]   ;;  %v2510_v52 = vld [vmem:[#allocation2 + $0x88] ss:$16 sps:$4 sm:$0xff]  }
  0x24   :  { %1069 = vmatpush1.bf16.msra.mxu1 %v2457_v9  ;;  %1358 = vmatpush1.bf16.msra.mxu0 %v2458_v10  ;;  %v2511_v53 = vld [vmem:[#allocation2 + $0xa4] ss:$16 sps:$4 sm:$0xff]   ;;  %v2513_v54 = vld [vmem:[#allocation2 + $0xac] ss:$16 sps:$4 sm:$0xff]   ;;  %v2515_v55 = vld [vmem:[#allocation2 + $0xa0] ss:$16 sps:$4 sm:$0xff]  }
  0x25   :  { %1070 = vmatprep.subr.bf16.mxu1 %v2701_v0  ;;  %1359 = vmatprep.subr.bf16.mxu0 %v2701_v0  ;;  %v2516_v56 = vld [vmem:[#allocation2 + $0xa8] ss:$16 sps:$4 sm:$0xff]   ;;  %v2517_v57 = vld [vmem:[#allocation2 + $0xc4] ss:$16 sps:$4 sm:$0xff]   ;;  %v2519_v58 = vld [vmem:[#allocation2 + $0xcc] ss:$16 sps:$4 sm:$0xff]  }
  0x26   :  { %v2521_v59 = vld [vmem:[#allocation2 + $0xc0] ss:$16 sps:$4 sm:$0xff]   ;;  %v2522_v60 = vld [vmem:[#allocation2 + $0xc8] ss:$16 sps:$4 sm:$0xff]   ;;  %v2523_v61 = vld [vmem:[#allocation2 + $0xe4] ss:$16 sps:$4 sm:$0xff]  }
  0x27   :  { %v2525_v62 = vld [vmem:[#allocation2 + $0xec] ss:$16 sps:$4 sm:$0xff]   ;;  %v2527_v63 = vld [vmem:[#allocation2 + $0xe0] ss:$16 sps:$4 sm:$0xff]   ;;  %v2529_v1 = vld [vmem:[#allocation2 + $0x104] ss:$16 sps:$4 sm:$0xff]  }
  0x28   :  { %1071 = vmatpush1.bf16.msra.mxu1 %v2459_v11  ;;  %1360 = vmatpush1.bf16.msra.mxu0 %v2460_v12  ;;  %v2531_v2 = vld [vmem:[#allocation2 + $0x10c] ss:$16 sps:$4 sm:$0xff]   ;;  %v2533_v3 = vld [vmem:[#allocation2 + $0x100] ss:$16 sps:$4 sm:$0xff]   ;;  %v2534_v4 = vld [vmem:[#allocation2 + $0x108] ss:$16 sps:$4 sm:$0xff]  }
  0x29   :  { %1072 = vmatprep.subr.bf16.mxu1 %v2701_v0  ;;  %1361 = vmatprep.subr.bf16.mxu0 %v2701_v0  ;;  %v2535_v5 = vld [vmem:[#allocation2 + $0x124] ss:$16 sps:$4 sm:$0xff]   ;;  %v2537_v6 = vld [vmem:[#allocation2 + $0x12c] ss:$16 sps:$4 sm:$0xff]   ;;  %v2539_v7 = vld [vmem:[#allocation2 + $0x120] ss:$16 sps:$4 sm:$0xff]  }
  0x2a   :  { %v2540_v8 = vld [vmem:[#allocation2 + $0x128] ss:$16 sps:$4 sm:$0xff]   ;;  %v2541_v9 = vld [vmem:[#allocation2 + $0x144] ss:$16 sps:$4 sm:$0xff]   ;;  %v2543_v10 = vld [vmem:[#allocation2 + $0x14c] ss:$16 sps:$4 sm:$0xff]  }
  0x2b   :  { %v2545_v11 = vld [vmem:[#allocation2 + $0x140] ss:$16 sps:$4 sm:$0xff]   ;;  %v2546_v12 = vld [vmem:[#allocation2 + $0x148] ss:$16 sps:$4 sm:$0xff]   ;;  %v2559_v21 = vld [vmem:[#allocation2 + $0x1a4] ss:$16 sps:$4 sm:$0xff]  }
  0x2c   :  { %1073 = vmatpush1.bf16.msra.mxu1 %v2461_v13  ;;  %1362 = vmatpush1.bf16.msra.mxu0 %v2462_v14  ;;  %v2547_v13 = vld [vmem:[#allocation2 + $0x164] ss:$16 sps:$4 sm:$0xff]   ;;  %v2549_v14 = vld [vmem:[#allocation2 + $0x16c] ss:$16 sps:$4 sm:$0xff]   ;;  %v2557_v19 = vld [vmem:[#allocation2 + $0x180] ss:$16 sps:$4 sm:$0xff]  }
  0x2d   :  { %1074 = vmatprep.subr.bf16.mxu1 %v2701_v0  ;;  %1363 = vmatprep.subr.bf16.mxu0 %v2701_v0 }
  0x30   :  { %1075 = vmatpush1.bf16.msra.mxu1 %v2463_v15  ;;  %1364 = vmatpush1.bf16.msra.mxu0 %v2464_v16  ;;  %v2551_v15 = vld [vmem:[#allocation2 + $0x160] ss:$16 sps:$4 sm:$0xff]   ;;  %v2552_v16 = vld [vmem:[#allocation2 + $0x168] ss:$16 sps:$4 sm:$0xff]  }
  0x31   :  { %1076 = vmatprep.subr.bf16.mxu1 %v2701_v0  ;;  %1365 = vmatprep.subr.bf16.mxu0 %v2701_v0 }
  0x34   :  { %1077 = vmatpush1.bf16.msra.mxu1 %v2465_v17  ;;  %1366 = vmatpush1.bf16.msra.mxu0 %v2466_v18  ;;  %v2553_v17 = vld [vmem:[#allocation2 + $0x184] ss:$16 sps:$4 sm:$0xff]   ;;  %v2555_v18 = vld [vmem:[#allocation2 + $0x18c] ss:$16 sps:$4 sm:$0xff]  }
  0x35   :  { %1078 = vmatprep.subr.bf16.mxu1 %v2701_v0  ;;  %1367 = vmatprep.subr.bf16.mxu0 %v2701_v0 }
  0x38   :  { %1079 = vmatpush1.bf16.msra.mxu1 %v2467_v20  ;;  %1368 = vmatpush1.bf16.msra.mxu0 %v2468_v22  ;;  %v2558_v20 = vld [vmem:[#allocation2 + $0x188] ss:$16 sps:$4 sm:$0xff]   ;;  %v2561_v22 = vld [vmem:[#allocation2 + $0x1ac] ss:$16 sps:$4 sm:$0xff]  }
  0x39   :  { %1080 = vmatprep.subr.bf16.mxu1 %v2701_v0  ;;  %1369 = vmatprep.subr.bf16.mxu0 %v2701_v0 }
  0x3c   :  { %1081 = vmatpush1.bf16.msra.mxu1 %v2469_v23  ;;  %1370 = vmatpush1.bf16.msra.mxu0 %v2470_v24  ;;  %v2563_v23 = vld [vmem:[#allocation2 + $0x1a0] ss:$16 sps:$4 sm:$0xff]   ;;  %v2564_v24 = vld [vmem:[#allocation2 + $0x1a8] ss:$16 sps:$4 sm:$0xff]  }
  0x3d   :  { %1082 = vmatprep.subr.bf16.mxu1 %v2701_v0  ;;  %1371 = vmatprep.subr.bf16.mxu0 %v2701_v0 }
  0x40   :  { %1083 = vmatpush1.bf16.msra.mxu1 %v2471_v25  ;;  %1372 = vmatpush1.bf16.msra.mxu0 %v2472_v26  ;;  %v2565_v25 = vld [vmem:[#allocation2 + $0x1c4] ss:$16 sps:$4 sm:$0xff]   ;;  %v2567_v26 = vld [vmem:[#allocation2 + $0x1cc] ss:$16 sps:$4 sm:$0xff]  }
  0x41   :  { %1084 = vmatprep.subr.bf16.mxu1 %v2701_v0  ;;  %1373 = vmatprep.subr.bf16.mxu0 %v2701_v0 }
  0x44   :  { %1085 = vmatpush1.bf16.msra.mxu1 %v2473_v27  ;;  %1374 = vmatpush1.bf16.msra.mxu0 %v2474_v28  ;;  %v2569_v27 = vld [vmem:[#allocation2 + $0x1c0] ss:$16 sps:$4 sm:$0xff]   ;;  %v2570_v28 = vld [vmem:[#allocation2 + $0x1c8] ss:$16 sps:$4 sm:$0xff]  }
  0x45   :  { %1086 = vmatprep.subr.bf16.mxu1 %v2701_v0  ;;  %1375 = vmatprep.subr.bf16.mxu0 %v2701_v0 }
  0x48   :  { %1087 = vmatpush1.bf16.msra.mxu1 %v2475_v29  ;;  %1376 = vmatpush1.bf16.msra.mxu0 %v2476_v30  ;;  %v2571_v29 = vld [vmem:[#allocation2 + $0x1e4] ss:$16 sps:$4 sm:$0xff]   ;;  %v2573_v30 = vld [vmem:[#allocation2 + $0x1ec] ss:$16 sps:$4 sm:$0xff]  }
  0x49   :  { %1088 = vmatprep.subr.bf16.mxu1 %v2701_v0  ;;  %1377 = vmatprep.subr.bf16.mxu0 %v2701_v0 }
  0x4c   :  { %1089 = vmatpush1.bf16.msra.mxu1 %v2477_v31  ;;  %1378 = vmatpush1.bf16.msra.mxu0 %v2478_v32  ;;  %v2575_v31 = vld [vmem:[#allocation2 + $0x1e0] ss:$16 sps:$4 sm:$0xff]   ;;  %v2576_v32 = vld [vmem:[#allocation2 + $0x1e8] ss:$16 sps:$4 sm:$0xff]  }
  0x4d   :  { %1090 = vmatprep.subr.bf16.mxu1 %v2701_v0  ;;  %1379 = vmatprep.subr.bf16.mxu0 %v2701_v0  ;;  %v2528_v0 = vld [vmem:[#allocation2 + $0xe8] ss:$16 sps:$4 sm:$0xff]  }
  0x50   :  { %1091 = vmatpush1.bf16.msra.mxu1 %v2479_v33  ;;  %1380 = vmatpush1.bf16.msra.mxu0 %v2480_v34  ;;  %v2577_v33 = vld [vmem:[#allocation2 + $0x204] ss:$16 sps:$4 sm:$0xff]   ;;  %v2579_v34 = vld [vmem:[#allocation2 + $0x20c] ss:$16 sps:$4 sm:$0xff]  }
  0x53   :  { %1093 = vmatmul.mubr.bf16.vlgmr.msra.gmra.mrb[0].mxu1 %v2481_v35  ;;  %1382 = vmatmul.mubr.bf16.vlgmr.msra.gmra.mrb[0].mxu0 %v2484_v36  ;;  %v2581_v35 = vld [vmem:[#allocation2 + $0x200] ss:$16 sps:$4 sm:$0xff]   ;;  %v2582_v36 = vld [vmem:[#allocation2 + $0x208] ss:$16 sps:$4 sm:$0xff]  }
  0x54   :  { %1100 = vmatprep.mubr.bf16.mxu1 %v2487_v37  ;;  %1389 = vmatprep.mubr.bf16.mxu0 %v2489_v38  ;;  %v2583_v37 = vld [vmem:[#allocation2 + $0x224] ss:$16 sps:$4 sm:$0xff]   ;;  %v2585_v38 = vld [vmem:[#allocation2 + $0x22c] ss:$16 sps:$4 sm:$0xff]  }
  0x5b   :  { %1101 = vmatmul.mubr.bf16.gmra.mrb[4].mxu1 %v2491_v39  ;;  %1390 = vmatmul.mubr.bf16.gmra.mrb[4].mxu0 %v2492_v40  ;;  %v2587_v39 = vld [vmem:[#allocation2 + $0x220] ss:$16 sps:$4 sm:$0xff]   ;;  %v2588_v40 = vld [vmem:[#allocation2 + $0x228] ss:$16 sps:$4 sm:$0xff]  }
  0x5c   :  { %1108 = vmatprep.mubr.bf16.mxu1 %v2493_v41  ;;  %1397 = vmatprep.mubr.bf16.mxu0 %v2495_v42  ;;  %v2589_v41 = vld [vmem:[#allocation2 + $0x244] ss:$16 sps:$4 sm:$0xff]   ;;  %v2591_v42 = vld [vmem:[#allocation2 + $0x24c] ss:$16 sps:$4 sm:$0xff]  }
  0x63   :  { %1109 = vmatmul.mubr.bf16.gmra.mrb[8].mxu1 %v2497_v43  ;;  %1398 = vmatmul.mubr.bf16.gmra.mrb[8].mxu0 %v2498_v44  ;;  %v2593_v43 = vld [vmem:[#allocation2 + $0x240] ss:$16 sps:$4 sm:$0xff]   ;;  %v2594_v44 = vld [vmem:[#allocation2 + $0x248] ss:$16 sps:$4 sm:$0xff]  }
  0x64   :  { %1116 = vmatprep.mubr.bf16.mxu1 %v2499_v45  ;;  %1405 = vmatprep.mubr.bf16.mxu0 %v2501_v46  ;;  %v2595_v45 = vld [vmem:[#allocation2 + $0x264] ss:$16 sps:$4 sm:$0xff]   ;;  %v2597_v46 = vld [vmem:[#allocation2 + $0x26c] ss:$16 sps:$4 sm:$0xff]  }
  0x6b   :  { %1117 = vmatmul.mubr.bf16.gmra.mrb[12].mxu1 %v2503_v47  ;;  %1406 = vmatmul.mubr.bf16.gmra.mrb[12].mxu0 %v2504_v48  ;;  %v2599_v47 = vld [vmem:[#allocation2 + $0x260] ss:$16 sps:$4 sm:$0xff]   ;;  %v2600_v48 = vld [vmem:[#allocation2 + $0x268] ss:$16 sps:$4 sm:$0xff]  }
  0x6c   :  { %1124 = vmatprep.mubr.bf16.mxu1 %v2505_v49  ;;  %1413 = vmatprep.mubr.bf16.mxu0 %v2507_v50  ;;  %v2601_v49 = vld [vmem:[#allocation2 + $0x284] ss:$16 sps:$4 sm:$0xff]   ;;  %v2603_v50 = vld [vmem:[#allocation2 + $0x28c] ss:$16 sps:$4 sm:$0xff]  }
  0x73   :  { %1125 = vmatmul.mubr.bf16.gmra.mrb[16].mxu1 %v2509_v51  ;;  %1414 = vmatmul.mubr.bf16.gmra.mrb[16].mxu0 %v2510_v52  ;;  %v2605_v51 = vld [vmem:[#allocation2 + $0x280] ss:$16 sps:$4 sm:$0xff]   ;;  %v2606_v52 = vld [vmem:[#allocation2 + $0x288] ss:$16 sps:$4 sm:$0xff]  }
  0x74   :  { %1132 = vmatprep.mubr.bf16.mxu1 %v2511_v53  ;;  %1421 = vmatprep.mubr.bf16.mxu0 %v2513_v54  ;;  %v2607_v53 = vld [vmem:[#allocation2 + $0x2a4] ss:$16 sps:$4 sm:$0xff]   ;;  %v2609_v54 = vld [vmem:[#allocation2 + $0x2ac] ss:$16 sps:$4 sm:$0xff]  }
  0x7b   :  { %1133 = vmatmul.mubr.bf16.gmra.mrb[20].mxu1 %v2515_v55  ;;  %1422 = vmatmul.mubr.bf16.gmra.mrb[20].mxu0 %v2516_v56  ;;  %v2611_v55 = vld [vmem:[#allocation2 + $0x2a0] ss:$16 sps:$4 sm:$0xff]   ;;  %v2612_v56 = vld [vmem:[#allocation2 + $0x2a8] ss:$16 sps:$4 sm:$0xff]  }
  0x7c   :  { %1140 = vmatprep.mubr.bf16.mxu1 %v2517_v57  ;;  %1429 = vmatprep.mubr.bf16.mxu0 %v2519_v58  ;;  %v2613_v57 = vld [vmem:[#allocation2 + $0x2c4] ss:$16 sps:$4 sm:$0xff]   ;;  %v2615_v58 = vld [vmem:[#allocation2 + $0x2cc] ss:$16 sps:$4 sm:$0xff]  }
  0x83   :  { %1141 = vmatmul.mubr.bf16.gmra.mrb[24].mxu1 %v2521_v59  ;;  %1430 = vmatmul.mubr.bf16.gmra.mrb[24].mxu0 %v2522_v60  ;;  %v2617_v59 = vld [vmem:[#allocation2 + $0x2c0] ss:$16 sps:$4 sm:$0xff]   ;;  %v2618_v60 = vld [vmem:[#allocation2 + $0x2c8] ss:$16 sps:$4 sm:$0xff]  }
  0x84   :  { %1148 = vmatprep.mubr.bf16.mxu1 %v2523_v61  ;;  %1437 = vmatprep.mubr.bf16.mxu0 %v2525_v62  ;;  %v2619_v61 = vld [vmem:[#allocation2 + $0x2e4] ss:$16 sps:$4 sm:$0xff]   ;;  %v2621_v62 = vld [vmem:[#allocation2 + $0x2ec] ss:$16 sps:$4 sm:$0xff]  }
  0x8b   :  { %1149 = vmatmul.mubr.bf16.gmra.mrb[28].mxu1 %v2527_v63  ;;  %1438 = vmatmul.mubr.bf16.gmra.mrb[28].mxu0 %v2528_v0  ;;  %v2623_v63 = vld [vmem:[#allocation2 + $0x2e0] ss:$16 sps:$4 sm:$0xff]   ;;  %v2624_v0 = vld [vmem:[#allocation2 + $0x2e8] ss:$16 sps:$4 sm:$0xff]  }
  0x8c   :  { %1156 = vmatprep.mubr.bf16.mxu1 %v2529_v1  ;;  %1445 = vmatprep.mubr.bf16.mxu0 %v2531_v2  ;;  %v2625_v1 = vld [vmem:[#allocation2 + $0x304] ss:$16 sps:$4 sm:$0xff]   ;;  %v2627_v2 = vld [vmem:[#allocation2 + $0x30c] ss:$16 sps:$4 sm:$0xff]  }
  0x93   :  { %1157 = vmatmul.mubr.bf16.gmra.mrb[32].mxu1 %v2533_v3  ;;  %1446 = vmatmul.mubr.bf16.gmra.mrb[32].mxu0 %v2534_v4  ;;  %v2629_v3 = vld [vmem:[#allocation2 + $0x300] ss:$16 sps:$4 sm:$0xff]   ;;  %v2630_v4 = vld [vmem:[#allocation2 + $0x308] ss:$16 sps:$4 sm:$0xff]  }
  0x94   :  { %1164 = vmatprep.mubr.bf16.mxu1 %v2535_v5  ;;  %1453 = vmatprep.mubr.bf16.mxu0 %v2537_v6  ;;  %v2631_v5 = vld [vmem:[#allocation2 + $0x324] ss:$16 sps:$4 sm:$0xff]   ;;  %v2633_v6 = vld [vmem:[#allocation2 + $0x32c] ss:$16 sps:$4 sm:$0xff]  }
  0x9b   :  { %1165 = vmatmul.mubr.bf16.gmra.mrb[36].mxu1 %v2539_v7  ;;  %1454 = vmatmul.mubr.bf16.gmra.mrb[36].mxu0 %v2540_v8  ;;  %v2635_v7 = vld [vmem:[#allocation2 + $0x320] ss:$16 sps:$4 sm:$0xff]   ;;  %v2636_v8 = vld [vmem:[#allocation2 + $0x328] ss:$16 sps:$4 sm:$0xff]  }
  0x9c   :  { %1172 = vmatprep.mubr.bf16.mxu1 %v2541_v9  ;;  %1461 = vmatprep.mubr.bf16.mxu0 %v2543_v10  ;;  %v2637_v9 = vld [vmem:[#allocation2 + $0x344] ss:$16 sps:$4 sm:$0xff]   ;;  %v2639_v10 = vld [vmem:[#allocation2 + $0x34c] ss:$16 sps:$4 sm:$0xff]  }
  0xa3   :  { %1173 = vmatmul.mubr.bf16.gmra.mrb[40].mxu1 %v2545_v11  ;;  %1462 = vmatmul.mubr.bf16.gmra.mrb[40].mxu0 %v2546_v12  ;;  %v2641_v11 = vld [vmem:[#allocation2 + $0x340] ss:$16 sps:$4 sm:$0xff]   ;;  %v2642_v12 = vld [vmem:[#allocation2 + $0x348] ss:$16 sps:$4 sm:$0xff]  }
  0xa4   :  { %1180 = vmatprep.mubr.bf16.mxu1 %v2547_v13  ;;  %1469 = vmatprep.mubr.bf16.mxu0 %v2549_v14  ;;  %v2643_v13 = vld [vmem:[#allocation2 + $0x364] ss:$16 sps:$4 sm:$0xff]   ;;  %v2645_v14 = vld [vmem:[#allocation2 + $0x36c] ss:$16 sps:$4 sm:$0xff]  }
  0xab   :  { %1181 = vmatmul.mubr.bf16.gmra.mrb[44].mxu1 %v2551_v15  ;;  %1470 = vmatmul.mubr.bf16.gmra.mrb[44].mxu0 %v2552_v16  ;;  %v2865_v15 = vld [vmem:[%s3194_s2] ss:$0 sm:$0xff] }
  0xac   :  { %1188 = vmatprep.mubr.bf16.mxu1 %v2553_v17  ;;  %1477 = vmatprep.mubr.bf16.mxu0 %v2555_v18 }
  0xb3   :  { %1189 = vmatmul.mubr.bf16.gmra.mrb[48].mxu1 %v2557_v19  ;;  %1478 = vmatmul.mubr.bf16.gmra.mrb[48].mxu0 %v2558_v20  ;;  %v2647_v20 = vld [vmem:[#allocation2 + $0x360] ss:$16 sps:$4 sm:$0xff]  }
  0xb4   :  { %1196 = vmatprep.mubr.bf16.mxu1 %v2559_v21  ;;  %1485 = vmatprep.mubr.bf16.mxu0 %v2561_v22 }
  0xbb   :  { %1197 = vmatmul.mubr.bf16.gmra.mrb[52].mxu1 %v2563_v23  ;;  %1486 = vmatmul.mubr.bf16.gmra.mrb[52].mxu0 %v2564_v24  ;;  %v2648_v23 = vld [vmem:[#allocation2 + $0x368] ss:$16 sps:$4 sm:$0xff]   ;;  %v2649_v24 = vld [vmem:[#allocation2 + $0x384] ss:$16 sps:$4 sm:$0xff]  }
  0xbc   :  { %1204 = vmatprep.mubr.bf16.mxu1 %v2565_v25  ;;  %1493 = vmatprep.mubr.bf16.mxu0 %v2567_v26 }
  0xc3   :  { %1205 = vmatmul.mubr.bf16.gmra.mrb[56].mxu1 %v2569_v27  ;;  %1494 = vmatmul.mubr.bf16.gmra.mrb[56].mxu0 %v2570_v28 }
  0xc4   :  { %1212 = vmatprep.mubr.bf16.mxu1 %v2571_v29  ;;  %1501 = vmatprep.mubr.bf16.mxu0 %v2573_v30  ;;  %v2651_v29 = vld [vmem:[#allocation2 + $0x38c] ss:$16 sps:$4 sm:$0xff]  }
  0xcb   :  { %1213 = vmatmul.mubr.bf16.gmra.mrb[60].mxu1 %v2575_v31  ;;  %1502 = vmatmul.mubr.bf16.gmra.mrb[60].mxu0 %v2576_v32 }
  0xcc   :  { %1220 = vmatprep.mubr.bf16.mxu1 %v2577_v33  ;;  %1509 = vmatprep.mubr.bf16.mxu0 %v2579_v34 }
  0xd3   :  { %1221 = vmatmul.mubr.bf16.gmra.mrb[64].mxu1 %v2581_v35  ;;  %1510 = vmatmul.mubr.bf16.gmra.mrb[64].mxu0 %v2582_v36 }
  0xd4   :  { %1228 = vmatprep.mubr.bf16.mxu1 %v2583_v37  ;;  %1517 = vmatprep.mubr.bf16.mxu0 %v2585_v38 }
  0xdb   :  { %1229 = vmatmul.mubr.bf16.gmra.mrb[68].mxu1 %v2587_v39  ;;  %1518 = vmatmul.mubr.bf16.gmra.mrb[68].mxu0 %v2588_v40  ;;  %v2653_v40 = vld [vmem:[#allocation2 + $0x380] ss:$16 sps:$4 sm:$0xff]  }
  0xdc   :  { %1236 = vmatprep.mubr.bf16.mxu1 %v2589_v41  ;;  %1525 = vmatprep.mubr.bf16.mxu0 %v2591_v42 }
  0xe3   :  { %1237 = vmatmul.mubr.bf16.gmra.mrb[72].mxu1 %v2593_v43  ;;  %1526 = vmatmul.mubr.bf16.gmra.mrb[72].mxu0 %v2594_v44  ;;  %v2654_v43 = vld [vmem:[#allocation2 + $0x388] ss:$16 sps:$4 sm:$0xff]   ;;  %v2655_v44 = vld [vmem:[#allocation2 + $0x3a4] ss:$16 sps:$4 sm:$0xff]  }
  0xe4   :  { %1244 = vmatprep.mubr.bf16.mxu1 %v2595_v45  ;;  %1533 = vmatprep.mubr.bf16.mxu0 %v2597_v46 }
  0xeb   :  { %1245 = vmatmul.mubr.bf16.gmra.mrb[76].mxu1 %v2599_v47  ;;  %1534 = vmatmul.mubr.bf16.gmra.mrb[76].mxu0 %v2600_v48 }
  0xec   :  { %1252 = vmatprep.mubr.bf16.mxu1 %v2601_v49  ;;  %1541 = vmatprep.mubr.bf16.mxu0 %v2603_v50  ;;  %v2657_v49 = vld [vmem:[#allocation2 + $0x3ac] ss:$16 sps:$4 sm:$0xff]  }
  0xf3   :  { %1253 = vmatmul.mubr.bf16.gmra.mrb[80].mxu1 %v2605_v51  ;;  %1542 = vmatmul.mubr.bf16.gmra.mrb[80].mxu0 %v2606_v52 }
  0xf4   :  { %1260 = vmatprep.mubr.bf16.mxu1 %v2607_v53  ;;  %1549 = vmatprep.mubr.bf16.mxu0 %v2609_v54 }
  0xfb   :  { %1261 = vmatmul.mubr.bf16.gmra.mrb[84].mxu1 %v2611_v55  ;;  %1550 = vmatmul.mubr.bf16.gmra.mrb[84].mxu0 %v2612_v56 }
  0xfc   :  { %1268 = vmatprep.mubr.bf16.mxu1 %v2613_v57  ;;  %1557 = vmatprep.mubr.bf16.mxu0 %v2615_v58 }
 0x103   :  { %1269 = vmatmul.mubr.bf16.gmra.mrb[88].mxu1 %v2617_v59  ;;  %1558 = vmatmul.mubr.bf16.gmra.mrb[88].mxu0 %v2618_v60  ;;  %v2659_v60 = vld [vmem:[#allocation2 + $0x3a0] ss:$16 sps:$4 sm:$0xff]  }
 0x104   :  { %1276 = vmatprep.mubr.bf16.mxu1 %v2619_v61  ;;  %1565 = vmatprep.mubr.bf16.mxu0 %v2621_v62 }
 0x10b   :  { %1277 = vmatmul.mubr.bf16.gmra.mrb[92].mxu1 %v2623_v63  ;;  %1566 = vmatmul.mubr.bf16.gmra.mrb[92].mxu0 %v2624_v0  ;;  %v2660_v63 = vld [vmem:[#allocation2 + $0x3a8] ss:$16 sps:$4 sm:$0xff]   ;;  %v2661_v0 = vld [vmem:[#allocation2 + $0x3c4] ss:$16 sps:$4 sm:$0xff]  }
 0x10c   :  { %1284 = vmatprep.mubr.bf16.mxu1 %v2625_v1  ;;  %1573 = vmatprep.mubr.bf16.mxu0 %v2627_v2 }
 0x113   :  { %1285 = vmatmul.mubr.bf16.gmra.mrb[96].mxu1 %v2629_v3  ;;  %1574 = vmatmul.mubr.bf16.gmra.mrb[96].mxu0 %v2630_v4 }
 0x114   :  { %1292 = vmatprep.mubr.bf16.mxu1 %v2631_v5  ;;  %1581 = vmatprep.mubr.bf16.mxu0 %v2633_v6  ;;  %v2663_v5 = vld [vmem:[#allocation2 + $0x3cc] ss:$16 sps:$4 sm:$0xff]  }
 0x11b   :  { %1293 = vmatmul.mubr.bf16.gmra.mrb[100].mxu1 %v2635_v7  ;;  %1582 = vmatmul.mubr.bf16.gmra.mrb[100].mxu0 %v2636_v8 }
 0x11c   :  { %1300 = vmatprep.mubr.bf16.mxu1 %v2637_v9  ;;  %1589 = vmatprep.mubr.bf16.mxu0 %v2639_v10 }
 0x123   :  { %1301 = vmatmul.mubr.bf16.gmra.mrb[104].mxu1 %v2641_v11  ;;  %1590 = vmatmul.mubr.bf16.gmra.mrb[104].mxu0 %v2642_v12 }
 0x124   :  { %1308 = vmatprep.mubr.bf16.mxu1 %v2643_v13  ;;  %1597 = vmatprep.mubr.bf16.mxu0 %v2645_v14 }
 0x126   :  { %v1094_v16 = vpop.f32.mrb[0].mxu1  ;;  %v1383_v18 = vpop.f32.mrb[0].mxu0 }
 0x127   :  { %v1095_v17 = vadd.f32 %v2865_v15, %v1094_v16  ;;  %v1096_v19 = vpop.f32.mrb[1].mxu1  ;;  %v1385_v21 = vpop.f32.mrb[1].mxu0 }
 0x128   :  { %v1097_v22 = vpop.f32.mrb[2].mxu1  ;;  %v1386_v27 = vpop.f32.mrb[2].mxu0  ;;  %v2667_v21 = vld [vmem:[#allocation2 + $0x3e4] ss:$16 sps:$4 sm:$0xff]  }
 0x129   :  { %v1384_v25 = vadd.f32 %v1383_v18, %v1095_v17  ;;  %v1098_v26 = vadd.f32 %v2865_v15, %v1097_v22  ;;  %v1099_v28 = vpop.f32.mrb[3].mxu1  ;;  %v1388_v30 = vpop.f32.mrb[3].mxu0  ;;  %v2665_v17 = vld [vmem:[#allocation2 + $0x3c0] ss:$16 sps:$4 sm:$0xff]  }
 0x12b   :  { %v1638_v31 = vmax.f32 %v1384_v25, 0.0  ;;  %v1387_v32 = vadd.f32 %v1386_v27, %v1098_v26  ;;  %1309 = vmatmul.mubr.bf16.gmra.mrb[108].mxu1 %v2647_v20  ;;  %1598 = vmatmul.mubr.bf16.gmra.mrb[108].mxu0 %v2648_v23  ;;  %v2666_v20 = vld [vmem:[#allocation2 + $0x3c8] ss:$16 sps:$4 sm:$0xff]   ;;  %v2669_v26 = vld [vmem:[#allocation2 + $0x3ec] ss:$16 sps:$4 sm:$0xff]  }
 0x12c   :  { %1316 = vmatprep.mubr.bf16.mxu1 %v2649_v24  ;;  %1605 = vmatprep.mubr.bf16.mxu0 %v2651_v29 }
 0x12d   :  { %v2253_v33 = vpack.c.bf16 %v1638_v31, %v1638_v31  ;;  %v1639_v34 = vmax.f32 %v1387_v32, 0.0 }
 0x12e   :  { %v1102_v35 = vpop.f32.mrb[4].mxu1  ;;  %v1391_v38 = vpop.f32.mrb[4].mxu0 }
 0x12f   :  { %1959 = vst.msk [vmem:[%s3195_s3] sm:$0xf] %vm1958_vm0, %v2253_v33  ;;  %v2254_v36 = vpack.c.bf16 %v1639_v34, %v1639_v34  ;;  %v1103_v37 = vadd.f32 %v2865_v15, %v1102_v35  ;;  %v1104_v39 = vpop.f32.mrb[5].mxu1  ;;  %v1393_v41 = vpop.f32.mrb[5].mxu0 }
 0x130   :  { %v1105_v42 = vpop.f32.mrb[6].mxu1  ;;  %v1394_v47 = vpop.f32.mrb[6].mxu0 }
 0x131   :  { %1960 = vst.msk [vmem:[%s3195_s3 + $0x4] sm:$0xf] %vm1958_vm0, %v2254_v36  ;;  %v1392_v45 = vadd.f32 %v1391_v38, %v1103_v37  ;;  %v1106_v46 = vadd.f32 %v2865_v15, %v1105_v42  ;;  %v1107_v48 = vpop.f32.mrb[7].mxu1  ;;  %v1396_v50 = vpop.f32.mrb[7].mxu0  ;;  %v2671_v37 = vld [vmem:[#allocation2 + $0x3e0] ss:$16 sps:$4 sm:$0xff]  }
 0x133   :  { %v1640_v51 = vmax.f32 %v1392_v45, 0.0  ;;  %v1395_v52 = vadd.f32 %v1394_v47, %v1106_v46  ;;  %1317 = vmatmul.mubr.bf16.gmra.mrb[112].mxu1 %v2653_v40  ;;  %1606 = vmatmul.mubr.bf16.gmra.mrb[112].mxu0 %v2654_v43  ;;  %v2672_v40 = vld [vmem:[#allocation2 + $0x3e8] ss:$16 sps:$4 sm:$0xff]  }
 0x134   :  { %1324 = vmatprep.mubr.bf16.mxu1 %v2655_v44  ;;  %1613 = vmatprep.mubr.bf16.mxu0 %v2657_v49 }
 0x135   :  { %v2255_v53 = vpack.c.bf16 %v1640_v51, %v1640_v51  ;;  %v1641_v54 = vmax.f32 %v1395_v52, 0.0 }
 0x136   :  { %v1110_v55 = vpop.f32.mrb[8].mxu1  ;;  %v1399_v58 = vpop.f32.mrb[8].mxu0 }
 0x137   :  { %1961 = vst.msk [vmem:[%s3195_s3 + $0x8] sm:$0xf] %vm1958_vm0, %v2255_v53  ;;  %v2256_v56 = vpack.c.bf16 %v1641_v54, %v1641_v54  ;;  %v1111_v57 = vadd.f32 %v2865_v15, %v1110_v55  ;;  %v1112_v59 = vpop.f32.mrb[9].mxu1  ;;  %v1401_v61 = vpop.f32.mrb[9].mxu0 }
 0x138   :  { %v1113_v62 = vpop.f32.mrb[10].mxu1  ;;  %v1402_v3 = vpop.f32.mrb[10].mxu0 }
 0x139   :  { %1962 = vst.msk [vmem:[%s3195_s3 + $0xc] sm:$0xf] %vm1958_vm0, %v2256_v56  ;;  %v1400_v1 = vadd.f32 %v1399_v58, %v1111_v57  ;;  %v1114_v2 = vadd.f32 %v2865_v15, %v1113_v62  ;;  %v1115_v4 = vpop.f32.mrb[11].mxu1  ;;  %v1404_v6 = vpop.f32.mrb[11].mxu0 }
 0x13b   :  { %v1642_v7 = vmax.f32 %v1400_v1, 0.0  ;;  %v1403_v8 = vadd.f32 %v1402_v3, %v1114_v2  ;;  %1325 = vmatmul.mubr.bf16.gmra.mrb[116].mxu1 %v2659_v60  ;;  %1614 = vmatmul.mubr.bf16.gmra.mrb[116].mxu0 %v2660_v63 }
 0x13c   :  { %1332 = vmatprep.mubr.bf16.mxu1 %v2661_v0  ;;  %1621 = vmatprep.mubr.bf16.mxu0 %v2663_v5 }
 0x13d   :  { %v2257_v9 = vpack.c.bf16 %v1642_v7, %v1642_v7  ;;  %v1643_v10 = vmax.f32 %v1403_v8, 0.0 }
 0x13e   :  { %v1118_v11 = vpop.f32.mrb[12].mxu1  ;;  %v1407_v14 = vpop.f32.mrb[12].mxu0 }
 0x13f   :  { %1963 = vst.msk [vmem:[%s3195_s3 + $0x10] sm:$0xf] %vm1958_vm0, %v2257_v9  ;;  %v2258_v12 = vpack.c.bf16 %v1643_v10, %v1643_v10  ;;  %v1119_v13 = vadd.f32 %v2865_v15, %v1118_v11  ;;  %v1120_v16 = vpop.f32.mrb[13].mxu1  ;;  %v1409_v18 = vpop.f32.mrb[13].mxu0 }
 0x140   :  { %v1121_v19 = vpop.f32.mrb[14].mxu1  ;;  %v1410_v24 = vpop.f32.mrb[14].mxu0 }
 0x141   :  { %1964 = vst.msk [vmem:[%s3195_s3 + $0x14] sm:$0xf] %vm1958_vm0, %v2258_v12  ;;  %v1408_v22 = vadd.f32 %v1407_v14, %v1119_v13  ;;  %v1122_v23 = vadd.f32 %v2865_v15, %v1121_v19  ;;  %v1123_v25 = vpop.f32.mrb[15].mxu1  ;;  %v1412_v27 = vpop.f32.mrb[15].mxu0 }
 0x143   :  { %v1644_v28 = vmax.f32 %v1408_v22, 0.0  ;;  %v1411_v29 = vadd.f32 %v1410_v24, %v1122_v23  ;;  %1333 = vmatmul.mubr.bf16.gmra.mrb[120].mxu1 %v2665_v17  ;;  %1622 = vmatmul.mubr.bf16.gmra.mrb[120].mxu0 %v2666_v20 }
 0x144   :  { %1340 = vmatprep.mubr.bf16.mxu1 %v2667_v21  ;;  %1629 = vmatprep.mubr.bf16.mxu0 %v2669_v26 }
 0x145   :  { %v2259_v30 = vpack.c.bf16 %v1644_v28, %v1644_v28  ;;  %v1645_v31 = vmax.f32 %v1411_v29, 0.0 }
 0x146   :  { %v1126_v32 = vpop.f32.mrb[16].mxu1  ;;  %v1415_v35 = vpop.f32.mrb[16].mxu0 }
 0x147   :  { %1965 = vst.msk [vmem:[%s3195_s3 + $0x18] sm:$0xf] %vm1958_vm0, %v2259_v30  ;;  %v2260_v33 = vpack.c.bf16 %v1645_v31, %v1645_v31  ;;  %v1127_v34 = vadd.f32 %v2865_v15, %v1126_v32  ;;  %v1128_v36 = vpop.f32.mrb[17].mxu1  ;;  %v1417_v38 = vpop.f32.mrb[17].mxu0 }
 0x148   :  { %v1129_v39 = vpop.f32.mrb[18].mxu1  ;;  %v1418_v43 = vpop.f32.mrb[18].mxu0 }
 0x149   :  { %1966 = vst.msk [vmem:[%s3195_s3 + $0x1c] sm:$0xf] %vm1958_vm0, %v2260_v33  ;;  %v1416_v41 = vadd.f32 %v1415_v35, %v1127_v34  ;;  %v1130_v42 = vadd.f32 %v2865_v15, %v1129_v39  ;;  %v1131_v44 = vpop.f32.mrb[19].mxu1  ;;  %v1420_v45 = vpop.f32.mrb[19].mxu0 }
 0x14b   :  { %v1646_v46 = vmax.f32 %v1416_v41, 0.0  ;;  %v1419_v47 = vadd.f32 %v1418_v43, %v1130_v42  ;;  %1341 = vmatmul.mubr.bf16.gmra.mrb[124].mxu1 %v2671_v37  ;;  %1630 = vmatmul.mubr.bf16.gmra.mrb[124].mxu0 %v2672_v40 }
 0x14d   :  { %v2261_v48 = vpack.c.bf16 %v1646_v46, %v1646_v46  ;;  %v1647_v49 = vmax.f32 %v1419_v47, 0.0 }
 0x14e   :  { %v1134_v50 = vpop.f32.mrb[20].mxu1  ;;  %v1423_v53 = vpop.f32.mrb[20].mxu0 }
 0x14f   :  { %1967 = vst.msk [vmem:[%s3195_s3 + $0x20] sm:$0xf] %vm1958_vm0, %v2261_v48  ;;  %v2262_v51 = vpack.c.bf16 %v1647_v49, %v1647_v49  ;;  %v1135_v52 = vadd.f32 %v2865_v15, %v1134_v50  ;;  %v1136_v54 = vpop.f32.mrb[21].mxu1  ;;  %v1425_v55 = vpop.f32.mrb[21].mxu0 }
 0x150   :  { %v1137_v56 = vpop.f32.mrb[22].mxu1  ;;  %v1426_v59 = vpop.f32.mrb[22].mxu0 }
 0x151   :  { %1968 = vst.msk [vmem:[%s3195_s3 + $0x24] sm:$0xf] %vm1958_vm0, %v2262_v51  ;;  %v1424_v57 = vadd.f32 %v1423_v53, %v1135_v52  ;;  %v1138_v58 = vadd.f32 %v2865_v15, %v1137_v56  ;;  %v1139_v60 = vpop.f32.mrb[23].mxu1  ;;  %v1428_v61 = vpop.f32.mrb[23].mxu0 }
 0x153   :  { %v1648_v62 = vmax.f32 %v1424_v57, 0.0  ;;  %v1427_v63 = vadd.f32 %v1426_v59, %v1138_v58 }
 0x155   :  { %v2263_v0 = vpack.c.bf16 %v1648_v62, %v1648_v62  ;;  %v1649_v1 = vmax.f32 %v1427_v63, 0.0 }
 0x156   :  { %v1142_v2 = vpop.f32.mrb[24].mxu1  ;;  %v1431_v5 = vpop.f32.mrb[24].mxu0 }
 0x157   :  { %1969 = vst.msk [vmem:[%s3195_s3 + $0x28] sm:$0xf] %vm1958_vm0, %v2263_v0  ;;  %v2264_v3 = vpack.c.bf16 %v1649_v1, %v1649_v1  ;;  %v1143_v4 = vadd.f32 %v2865_v15, %v1142_v2  ;;  %v1144_v6 = vpop.f32.mrb[25].mxu1  ;;  %v1433_v7 = vpop.f32.mrb[25].mxu0 }
 0x158   :  { %v1145_v8 = vpop.f32.mrb[26].mxu1  ;;  %v1434_v11 = vpop.f32.mrb[26].mxu0 }
 0x159   :  { %1970 = vst.msk [vmem:[%s3195_s3 + $0x2c] sm:$0xf] %vm1958_vm0, %v2264_v3  ;;  %v1432_v9 = vadd.f32 %v1431_v5, %v1143_v4  ;;  %v1146_v10 = vadd.f32 %v2865_v15, %v1145_v8  ;;  %v1147_v12 = vpop.f32.mrb[27].mxu1  ;;  %v1436_v13 = vpop.f32.mrb[27].mxu0 }
 0x15b   :  { %v1650_v14 = vmax.f32 %v1432_v9, 0.0  ;;  %v1435_v16 = vadd.f32 %v1434_v11, %v1146_v10 }
 0x15d   :  { %v2265_v17 = vpack.c.bf16 %v1650_v14, %v1650_v14  ;;  %v1651_v18 = vmax.f32 %v1435_v16, 0.0 }
 0x15e   :  { %v1150_v19 = vpop.f32.mrb[28].mxu1  ;;  %v1439_v22 = vpop.f32.mrb[28].mxu0 }
 0x15f   :  { %1971 = vst.msk [vmem:[%s3195_s3 + $0x30] sm:$0xf] %vm1958_vm0, %v2265_v17  ;;  %v2266_v20 = vpack.c.bf16 %v1651_v18, %v1651_v18  ;;  %v1151_v21 = vadd.f32 %v2865_v15, %v1150_v19  ;;  %v1152_v23 = vpop.f32.mrb[29].mxu1  ;;  %v1441_v24 = vpop.f32.mrb[29].mxu0 }
 0x160   :  { %v1153_v25 = vpop.f32.mrb[30].mxu1  ;;  %v1442_v28 = vpop.f32.mrb[30].mxu0 }
 0x161   :  { %1972 = vst.msk [vmem:[%s3195_s3 + $0x34] sm:$0xf] %vm1958_vm0, %v2266_v20  ;;  %v1440_v26 = vadd.f32 %v1439_v22, %v1151_v21  ;;  %v1154_v27 = vadd.f32 %v2865_v15, %v1153_v25  ;;  %v1155_v29 = vpop.f32.mrb[31].mxu1  ;;  %v1444_v30 = vpop.f32.mrb[31].mxu0 }
 0x163   :  { %v1652_v31 = vmax.f32 %v1440_v26, 0.0  ;;  %v1443_v32 = vadd.f32 %v1442_v28, %v1154_v27 }
 0x165   :  { %v2267_v33 = vpack.c.bf16 %v1652_v31, %v1652_v31  ;;  %v1653_v34 = vmax.f32 %v1443_v32, 0.0 }
 0x166   :  { %v1158_v35 = vpop.f32.mrb[32].mxu1  ;;  %v1447_v38 = vpop.f32.mrb[32].mxu0 }
 0x167   :  { %1973 = vst.msk [vmem:[%s3195_s3 + $0x38] sm:$0xf] %vm1958_vm0, %v2267_v33  ;;  %v2268_v36 = vpack.c.bf16 %v1653_v34, %v1653_v34  ;;  %v1159_v37 = vadd.f32 %v2865_v15, %v1158_v35  ;;  %v1160_v39 = vpop.f32.mrb[33].mxu1  ;;  %v1449_v40 = vpop.f32.mrb[33].mxu0 }
 0x168   :  { %v1161_v41 = vpop.f32.mrb[34].mxu1  ;;  %v1450_v44 = vpop.f32.mrb[34].mxu0 }
 0x169   :  { %1974 = vst.msk [vmem:[%s3195_s3 + $0x3c] sm:$0xf] %vm1958_vm0, %v2268_v36  ;;  %v1448_v42 = vadd.f32 %v1447_v38, %v1159_v37  ;;  %v1162_v43 = vadd.f32 %v2865_v15, %v1161_v41  ;;  %v1163_v45 = vpop.f32.mrb[35].mxu1  ;;  %v1452_v46 = vpop.f32.mrb[35].mxu0 }
 0x16b   :  { %v1654_v47 = vmax.f32 %v1448_v42, 0.0  ;;  %v1451_v48 = vadd.f32 %v1450_v44, %v1162_v43 }
 0x16d   :  { %v2269_v49 = vpack.c.bf16 %v1654_v47, %v1654_v47  ;;  %v1655_v50 = vmax.f32 %v1451_v48, 0.0 }
 0x16e   :  { %v1166_v51 = vpop.f32.mrb[36].mxu1  ;;  %v1455_v54 = vpop.f32.mrb[36].mxu0 }
 0x16f   :  { %1975 = vst.msk [vmem:[%s3195_s3 + $0x40] sm:$0xf] %vm1958_vm0, %v2269_v49  ;;  %v2270_v52 = vpack.c.bf16 %v1655_v50, %v1655_v50  ;;  %v1167_v53 = vadd.f32 %v2865_v15, %v1166_v51  ;;  %v1168_v55 = vpop.f32.mrb[37].mxu1  ;;  %v1457_v56 = vpop.f32.mrb[37].mxu0 }
 0x170   :  { %v1169_v57 = vpop.f32.mrb[38].mxu1  ;;  %v1458_v60 = vpop.f32.mrb[38].mxu0 }
 0x171   :  { %1976 = vst.msk [vmem:[%s3195_s3 + $0x44] sm:$0xf] %vm1958_vm0, %v2270_v52  ;;  %v1456_v58 = vadd.f32 %v1455_v54, %v1167_v53  ;;  %v1170_v59 = vadd.f32 %v2865_v15, %v1169_v57  ;;  %v1171_v61 = vpop.f32.mrb[39].mxu1  ;;  %v1460_v62 = vpop.f32.mrb[39].mxu0 }
 0x173   :  { %v1656_v63 = vmax.f32 %v1456_v58, 0.0  ;;  %v1459_v0 = vadd.f32 %v1458_v60, %v1170_v59 }
 0x175   :  { %v2271_v1 = vpack.c.bf16 %v1656_v63, %v1656_v63  ;;  %v1657_v2 = vmax.f32 %v1459_v0, 0.0 }
 0x176   :  { %v1174_v3 = vpop.f32.mrb[40].mxu1  ;;  %v1463_v6 = vpop.f32.mrb[40].mxu0 }
 0x177   :  { %1977 = vst.msk [vmem:[%s3195_s3 + $0x48] sm:$0xf] %vm1958_vm0, %v2271_v1  ;;  %v2272_v4 = vpack.c.bf16 %v1657_v2, %v1657_v2  ;;  %v1175_v5 = vadd.f32 %v2865_v15, %v1174_v3  ;;  %v1176_v7 = vpop.f32.mrb[41].mxu1  ;;  %v1465_v8 = vpop.f32.mrb[41].mxu0 }
 0x178   :  { %v1177_v9 = vpop.f32.mrb[42].mxu1  ;;  %v1466_v12 = vpop.f32.mrb[42].mxu0 }
 0x179   :  { %1978 = vst.msk [vmem:[%s3195_s3 + $0x4c] sm:$0xf] %vm1958_vm0, %v2272_v4  ;;  %v1464_v10 = vadd.f32 %v1463_v6, %v1175_v5  ;;  %v1178_v11 = vadd.f32 %v2865_v15, %v1177_v9  ;;  %v1179_v13 = vpop.f32.mrb[43].mxu1  ;;  %v1468_v14 = vpop.f32.mrb[43].mxu0 }
 0x17b   :  { %v1658_v16 = vmax.f32 %v1464_v10, 0.0  ;;  %v1467_v17 = vadd.f32 %v1466_v12, %v1178_v11 }
 0x17d   :  { %v2273_v18 = vpack.c.bf16 %v1658_v16, %v1658_v16  ;;  %v1659_v19 = vmax.f32 %v1467_v17, 0.0 }
 0x17e   :  { %v1182_v20 = vpop.f32.mrb[44].mxu1  ;;  %v1471_v23 = vpop.f32.mrb[44].mxu0 }
 0x17f   :  { %1979 = vst.msk [vmem:[%s3195_s3 + $0x50] sm:$0xf] %vm1958_vm0, %v2273_v18  ;;  %v2274_v21 = vpack.c.bf16 %v1659_v19, %v1659_v19  ;;  %v1183_v22 = vadd.f32 %v2865_v15, %v1182_v20  ;;  %v1184_v24 = vpop.f32.mrb[45].mxu1  ;;  %v1473_v25 = vpop.f32.mrb[45].mxu0 }
 0x180   :  { %v1185_v26 = vpop.f32.mrb[46].mxu1  ;;  %v1474_v29 = vpop.f32.mrb[46].mxu0 }
 0x181   :  { %1980 = vst.msk [vmem:[%s3195_s3 + $0x54] sm:$0xf] %vm1958_vm0, %v2274_v21  ;;  %v1472_v27 = vadd.f32 %v1471_v23, %v1183_v22  ;;  %v1186_v28 = vadd.f32 %v2865_v15, %v1185_v26  ;;  %v1187_v30 = vpop.f32.mrb[47].mxu1  ;;  %v1476_v31 = vpop.f32.mrb[47].mxu0 }
 0x183   :  { %v1660_v32 = vmax.f32 %v1472_v27, 0.0  ;;  %v1475_v33 = vadd.f32 %v1474_v29, %v1186_v28 }
 0x185   :  { %v2275_v34 = vpack.c.bf16 %v1660_v32, %v1660_v32  ;;  %v1661_v35 = vmax.f32 %v1475_v33, 0.0 }
 0x186   :  { %v1190_v36 = vpop.f32.mrb[48].mxu1  ;;  %v1479_v39 = vpop.f32.mrb[48].mxu0 }
 0x187   :  { %1981 = vst.msk [vmem:[%s3195_s3 + $0x58] sm:$0xf] %vm1958_vm0, %v2275_v34  ;;  %v2276_v37 = vpack.c.bf16 %v1661_v35, %v1661_v35  ;;  %v1191_v38 = vadd.f32 %v2865_v15, %v1190_v36  ;;  %v1192_v40 = vpop.f32.mrb[49].mxu1  ;;  %v1481_v41 = vpop.f32.mrb[49].mxu0 }
 0x188   :  { %v1193_v42 = vpop.f32.mrb[50].mxu1  ;;  %v1482_v45 = vpop.f32.mrb[50].mxu0 }
 0x189   :  { %1982 = vst.msk [vmem:[%s3195_s3 + $0x5c] sm:$0xf] %vm1958_vm0, %v2276_v37  ;;  %v1480_v43 = vadd.f32 %v1479_v39, %v1191_v38  ;;  %v1194_v44 = vadd.f32 %v2865_v15, %v1193_v42  ;;  %v1195_v46 = vpop.f32.mrb[51].mxu1  ;;  %v1484_v47 = vpop.f32.mrb[51].mxu0 }
 0x18b   :  { %v1662_v48 = vmax.f32 %v1480_v43, 0.0  ;;  %v1483_v49 = vadd.f32 %v1482_v45, %v1194_v44 }
 0x18d   :  { %v2277_v50 = vpack.c.bf16 %v1662_v48, %v1662_v48  ;;  %v1663_v51 = vmax.f32 %v1483_v49, 0.0 }
 0x18e   :  { %v1198_v52 = vpop.f32.mrb[52].mxu1  ;;  %v1487_v55 = vpop.f32.mrb[52].mxu0 }
 0x18f   :  { %1983 = vst.msk [vmem:[%s3195_s3 + $0x60] sm:$0xf] %vm1958_vm0, %v2277_v50  ;;  %v2278_v53 = vpack.c.bf16 %v1663_v51, %v1663_v51  ;;  %v1199_v54 = vadd.f32 %v2865_v15, %v1198_v52  ;;  %v1200_v56 = vpop.f32.mrb[53].mxu1  ;;  %v1489_v57 = vpop.f32.mrb[53].mxu0 }
 0x190   :  { %v1201_v58 = vpop.f32.mrb[54].mxu1  ;;  %v1490_v61 = vpop.f32.mrb[54].mxu0 }
 0x191   :  { %1984 = vst.msk [vmem:[%s3195_s3 + $0x64] sm:$0xf] %vm1958_vm0, %v2278_v53  ;;  %v1488_v59 = vadd.f32 %v1487_v55, %v1199_v54  ;;  %v1202_v60 = vadd.f32 %v2865_v15, %v1201_v58  ;;  %v1203_v62 = vpop.f32.mrb[55].mxu1  ;;  %v1492_v63 = vpop.f32.mrb[55].mxu0 }
 0x193   :  { %v1664_v0 = vmax.f32 %v1488_v59, 0.0  ;;  %v1491_v1 = vadd.f32 %v1490_v61, %v1202_v60 }
 0x195   :  { %v2279_v2 = vpack.c.bf16 %v1664_v0, %v1664_v0  ;;  %v1665_v3 = vmax.f32 %v1491_v1, 0.0 }
 0x196   :  { %v1206_v4 = vpop.f32.mrb[56].mxu1  ;;  %v1495_v7 = vpop.f32.mrb[56].mxu0 }
 0x197   :  { %1985 = vst.msk [vmem:[%s3195_s3 + $0x68] sm:$0xf] %vm1958_vm0, %v2279_v2  ;;  %v2280_v5 = vpack.c.bf16 %v1665_v3, %v1665_v3  ;;  %v1207_v6 = vadd.f32 %v2865_v15, %v1206_v4  ;;  %v1208_v8 = vpop.f32.mrb[57].mxu1  ;;  %v1497_v9 = vpop.f32.mrb[57].mxu0 }
 0x198   :  { %v1209_v10 = vpop.f32.mrb[58].mxu1  ;;  %v1498_v13 = vpop.f32.mrb[58].mxu0 }
 0x199   :  { %1986 = vst.msk [vmem:[%s3195_s3 + $0x6c] sm:$0xf] %vm1958_vm0, %v2280_v5  ;;  %v1496_v11 = vadd.f32 %v1495_v7, %v1207_v6  ;;  %v1210_v12 = vadd.f32 %v2865_v15, %v1209_v10  ;;  %v1211_v14 = vpop.f32.mrb[59].mxu1  ;;  %v1500_v16 = vpop.f32.mrb[59].mxu0 }
 0x19b   :  { %v1666_v17 = vmax.f32 %v1496_v11, 0.0  ;;  %v1499_v18 = vadd.f32 %v1498_v13, %v1210_v12 }
 0x19d   :  { %v2281_v19 = vpack.c.bf16 %v1666_v17, %v1666_v17  ;;  %v1667_v20 = vmax.f32 %v1499_v18, 0.0 }
 0x19e   :  { %v1214_v21 = vpop.f32.mrb[60].mxu1  ;;  %v1503_v24 = vpop.f32.mrb[60].mxu0 }
 0x19f   :  { %1987 = vst.msk [vmem:[%s3195_s3 + $0x70] sm:$0xf] %vm1958_vm0, %v2281_v19  ;;  %v2282_v22 = vpack.c.bf16 %v1667_v20, %v1667_v20  ;;  %v1215_v23 = vadd.f32 %v2865_v15, %v1214_v21  ;;  %v1216_v25 = vpop.f32.mrb[61].mxu1  ;;  %v1505_v26 = vpop.f32.mrb[61].mxu0 }
 0x1a0   :  { %v1217_v27 = vpop.f32.mrb[62].mxu1  ;;  %v1506_v30 = vpop.f32.mrb[62].mxu0 }
 0x1a1   :  { %1988 = vst.msk [vmem:[%s3195_s3 + $0x74] sm:$0xf] %vm1958_vm0, %v2282_v22  ;;  %v1504_v28 = vadd.f32 %v1503_v24, %v1215_v23  ;;  %v1218_v29 = vadd.f32 %v2865_v15, %v1217_v27  ;;  %v1219_v31 = vpop.f32.mrb[63].mxu1  ;;  %v1508_v32 = vpop.f32.mrb[63].mxu0 }
 0x1a3   :  { %v1668_v33 = vmax.f32 %v1504_v28, 0.0  ;;  %v1507_v34 = vadd.f32 %v1506_v30, %v1218_v29 }
 0x1a5   :  { %v2283_v35 = vpack.c.bf16 %v1668_v33, %v1668_v33  ;;  %v1669_v36 = vmax.f32 %v1507_v34, 0.0 }
 0x1a6   :  { %v1222_v37 = vpop.f32.mrb[64].mxu1  ;;  %v1511_v40 = vpop.f32.mrb[64].mxu0 }
 0x1a7   :  { %1989 = vst.msk [vmem:[%s3195_s3 + $0x78] sm:$0xf] %vm1958_vm0, %v2283_v35  ;;  %v2284_v38 = vpack.c.bf16 %v1669_v36, %v1669_v36  ;;  %v1223_v39 = vadd.f32 %v2865_v15, %v1222_v37  ;;  %v1224_v41 = vpop.f32.mrb[65].mxu1  ;;  %v1513_v42 = vpop.f32.mrb[65].mxu0 }
 0x1a8   :  { %v1225_v43 = vpop.f32.mrb[66].mxu1  ;;  %v1514_v46 = vpop.f32.mrb[66].mxu0 }
 0x1a9   :  { %1990 = vst.msk [vmem:[%s3195_s3 + $0x7c] sm:$0xf] %vm1958_vm0, %v2284_v38  ;;  %v1512_v44 = vadd.f32 %v1511_v40, %v1223_v39  ;;  %v1226_v45 = vadd.f32 %v2865_v15, %v1225_v43  ;;  %v1227_v47 = vpop.f32.mrb[67].mxu1  ;;  %v1516_v48 = vpop.f32.mrb[67].mxu0 }
 0x1ab   :  { %v1670_v49 = vmax.f32 %v1512_v44, 0.0  ;;  %v1515_v50 = vadd.f32 %v1514_v46, %v1226_v45 }
 0x1ad   :  { %v2285_v51 = vpack.c.bf16 %v1670_v49, %v1670_v49  ;;  %v1671_v52 = vmax.f32 %v1515_v50, 0.0 }
 0x1ae   :  { %v1230_v53 = vpop.f32.mrb[68].mxu1  ;;  %v1519_v56 = vpop.f32.mrb[68].mxu0 }
 0x1af   :  { %1991 = vst.msk [vmem:[%s3195_s3 + $0x80] sm:$0xf] %vm1958_vm0, %v2285_v51  ;;  %v2286_v54 = vpack.c.bf16 %v1671_v52, %v1671_v52  ;;  %v1231_v55 = vadd.f32 %v2865_v15, %v1230_v53  ;;  %v1232_v57 = vpop.f32.mrb[69].mxu1  ;;  %v1521_v58 = vpop.f32.mrb[69].mxu0 }
 0x1b0   :  { %v1233_v59 = vpop.f32.mrb[70].mxu1  ;;  %v1522_v62 = vpop.f32.mrb[70].mxu0 }
 0x1b1   :  { %1992 = vst.msk [vmem:[%s3195_s3 + $0x84] sm:$0xf] %vm1958_vm0, %v2286_v54  ;;  %v1520_v60 = vadd.f32 %v1519_v56, %v1231_v55  ;;  %v1234_v61 = vadd.f32 %v2865_v15, %v1233_v59  ;;  %v1235_v63 = vpop.f32.mrb[71].mxu1  ;;  %v1524_v0 = vpop.f32.mrb[71].mxu0 }
 0x1b3   :  { %v1672_v1 = vmax.f32 %v1520_v60, 0.0  ;;  %v1523_v2 = vadd.f32 %v1522_v62, %v1234_v61 }
 0x1b5   :  { %v2287_v3 = vpack.c.bf16 %v1672_v1, %v1672_v1  ;;  %v1673_v4 = vmax.f32 %v1523_v2, 0.0 }
 0x1b6   :  { %v1238_v5 = vpop.f32.mrb[72].mxu1  ;;  %v1527_v8 = vpop.f32.mrb[72].mxu0 }
 0x1b7   :  { %1993 = vst.msk [vmem:[%s3195_s3 + $0x88] sm:$0xf] %vm1958_vm0, %v2287_v3  ;;  %v2288_v6 = vpack.c.bf16 %v1673_v4, %v1673_v4  ;;  %v1239_v7 = vadd.f32 %v2865_v15, %v1238_v5  ;;  %v1240_v9 = vpop.f32.mrb[73].mxu1  ;;  %v1529_v10 = vpop.f32.mrb[73].mxu0 }
 0x1b8   :  { %v1241_v11 = vpop.f32.mrb[74].mxu1  ;;  %v1530_v14 = vpop.f32.mrb[74].mxu0 }
 0x1b9   :  { %1994 = vst.msk [vmem:[%s3195_s3 + $0x8c] sm:$0xf] %vm1958_vm0, %v2288_v6  ;;  %v1528_v12 = vadd.f32 %v1527_v8, %v1239_v7  ;;  %v1242_v13 = vadd.f32 %v2865_v15, %v1241_v11  ;;  %v1243_v16 = vpop.f32.mrb[75].mxu1  ;;  %v1532_v17 = vpop.f32.mrb[75].mxu0 }
 0x1bb   :  { %v1674_v18 = vmax.f32 %v1528_v12, 0.0  ;;  %v1531_v19 = vadd.f32 %v1530_v14, %v1242_v13 }
 0x1bd   :  { %v2289_v20 = vpack.c.bf16 %v1674_v18, %v1674_v18  ;;  %v1675_v21 = vmax.f32 %v1531_v19, 0.0 }
 0x1be   :  { %v1246_v22 = vpop.f32.mrb[76].mxu1  ;;  %v1535_v25 = vpop.f32.mrb[76].mxu0 }
 0x1bf   :  { %1995 = vst.msk [vmem:[%s3195_s3 + $0x90] sm:$0xf] %vm1958_vm0, %v2289_v20  ;;  %v2290_v23 = vpack.c.bf16 %v1675_v21, %v1675_v21  ;;  %v1247_v24 = vadd.f32 %v2865_v15, %v1246_v22  ;;  %v1248_v26 = vpop.f32.mrb[77].mxu1  ;;  %v1537_v27 = vpop.f32.mrb[77].mxu0 }
 0x1c0   :  { %v1249_v28 = vpop.f32.mrb[78].mxu1  ;;  %v1538_v31 = vpop.f32.mrb[78].mxu0 }
 0x1c1   :  { %1996 = vst.msk [vmem:[%s3195_s3 + $0x94] sm:$0xf] %vm1958_vm0, %v2290_v23  ;;  %v1536_v29 = vadd.f32 %v1535_v25, %v1247_v24  ;;  %v1250_v30 = vadd.f32 %v2865_v15, %v1249_v28  ;;  %v1251_v32 = vpop.f32.mrb[79].mxu1  ;;  %v1540_v33 = vpop.f32.mrb[79].mxu0 }
 0x1c3   :  { %v1676_v34 = vmax.f32 %v1536_v29, 0.0  ;;  %v1539_v35 = vadd.f32 %v1538_v31, %v1250_v30 }
 0x1c5   :  { %v2291_v36 = vpack.c.bf16 %v1676_v34, %v1676_v34  ;;  %v1677_v37 = vmax.f32 %v1539_v35, 0.0 }
 0x1c6   :  { %v1254_v38 = vpop.f32.mrb[80].mxu1  ;;  %v1543_v41 = vpop.f32.mrb[80].mxu0 }
 0x1c7   :  { %1997 = vst.msk [vmem:[%s3195_s3 + $0x98] sm:$0xf] %vm1958_vm0, %v2291_v36  ;;  %v2292_v39 = vpack.c.bf16 %v1677_v37, %v1677_v37  ;;  %v1255_v40 = vadd.f32 %v2865_v15, %v1254_v38  ;;  %v1256_v42 = vpop.f32.mrb[81].mxu1  ;;  %v1545_v43 = vpop.f32.mrb[81].mxu0 }
 0x1c8   :  { %v1257_v44 = vpop.f32.mrb[82].mxu1  ;;  %v1546_v47 = vpop.f32.mrb[82].mxu0 }
 0x1c9   :  { %1998 = vst.msk [vmem:[%s3195_s3 + $0x9c] sm:$0xf] %vm1958_vm0, %v2292_v39  ;;  %v1544_v45 = vadd.f32 %v1543_v41, %v1255_v40  ;;  %v1258_v46 = vadd.f32 %v2865_v15, %v1257_v44  ;;  %v1259_v48 = vpop.f32.mrb[83].mxu1  ;;  %v1548_v49 = vpop.f32.mrb[83].mxu0 }
 0x1cb   :  { %v1678_v50 = vmax.f32 %v1544_v45, 0.0  ;;  %v1547_v51 = vadd.f32 %v1546_v47, %v1258_v46 }
 0x1cd   :  { %v2293_v52 = vpack.c.bf16 %v1678_v50, %v1678_v50  ;;  %v1679_v53 = vmax.f32 %v1547_v51, 0.0 }
 0x1ce   :  { %v1262_v54 = vpop.f32.mrb[84].mxu1  ;;  %v1551_v57 = vpop.f32.mrb[84].mxu0 }
 0x1cf   :  { %1999 = vst.msk [vmem:[%s3195_s3 + $0xa0] sm:$0xf] %vm1958_vm0, %v2293_v52  ;;  %v2294_v55 = vpack.c.bf16 %v1679_v53, %v1679_v53  ;;  %v1263_v56 = vadd.f32 %v2865_v15, %v1262_v54  ;;  %v1264_v58 = vpop.f32.mrb[85].mxu1  ;;  %v1553_v59 = vpop.f32.mrb[85].mxu0 }
 0x1d0   :  { %v1265_v60 = vpop.f32.mrb[86].mxu1  ;;  %v1554_v63 = vpop.f32.mrb[86].mxu0 }
 0x1d1   :  { %2000 = vst.msk [vmem:[%s3195_s3 + $0xa4] sm:$0xf] %vm1958_vm0, %v2294_v55  ;;  %v1552_v61 = vadd.f32 %v1551_v57, %v1263_v56  ;;  %v1266_v62 = vadd.f32 %v2865_v15, %v1265_v60  ;;  %v1267_v0 = vpop.f32.mrb[87].mxu1  ;;  %v1556_v1 = vpop.f32.mrb[87].mxu0 }
 0x1d3   :  { %v1680_v2 = vmax.f32 %v1552_v61, 0.0  ;;  %v1555_v3 = vadd.f32 %v1554_v63, %v1266_v62 }
 0x1d5   :  { %v2295_v4 = vpack.c.bf16 %v1680_v2, %v1680_v2  ;;  %v1681_v5 = vmax.f32 %v1555_v3, 0.0 }
 0x1d6   :  { %v1270_v6 = vpop.f32.mrb[88].mxu1  ;;  %v1559_v9 = vpop.f32.mrb[88].mxu0 }
 0x1d7   :  { %2001 = vst.msk [vmem:[%s3195_s3 + $0xa8] sm:$0xf] %vm1958_vm0, %v2295_v4  ;;  %v2296_v7 = vpack.c.bf16 %v1681_v5, %v1681_v5  ;;  %v1271_v8 = vadd.f32 %v2865_v15, %v1270_v6  ;;  %v1272_v10 = vpop.f32.mrb[89].mxu1  ;;  %v1561_v11 = vpop.f32.mrb[89].mxu0 }
 0x1d8   :  { %v1273_v12 = vpop.f32.mrb[90].mxu1  ;;  %v1562_v16 = vpop.f32.mrb[90].mxu0 }
 0x1d9   :  { %2002 = vst.msk [vmem:[%s3195_s3 + $0xac] sm:$0xf] %vm1958_vm0, %v2296_v7  ;;  %v1560_v13 = vadd.f32 %v1559_v9, %v1271_v8  ;;  %v1274_v14 = vadd.f32 %v2865_v15, %v1273_v12  ;;  %v1275_v17 = vpop.f32.mrb[91].mxu1  ;;  %v1564_v18 = vpop.f32.mrb[91].mxu0 }
 0x1db   :  { %v1682_v19 = vmax.f32 %v1560_v13, 0.0  ;;  %v1563_v20 = vadd.f32 %v1562_v16, %v1274_v14  ;;  %v3131_v16 = vld [vmem:[%s3194_s2] ss:$0 sm:$0xff] }
 0x1dd   :  { %v2297_v21 = vpack.c.bf16 %v1682_v19, %v1682_v19  ;;  %v1683_v22 = vmax.f32 %v1563_v20, 0.0 }
 0x1de   :  { %v1278_v23 = vpop.f32.mrb[92].mxu1  ;;  %v1567_v26 = vpop.f32.mrb[92].mxu0 }
 0x1df   :  { %2003 = vst.msk [vmem:[%s3195_s3 + $0xb0] sm:$0xf] %vm1958_vm0, %v2297_v21  ;;  %v2298_v24 = vpack.c.bf16 %v1683_v22, %v1683_v22  ;;  %v1279_v25 = vadd.f32 %v2865_v15, %v1278_v23  ;;  %v1280_v27 = vpop.f32.mrb[93].mxu1  ;;  %v1569_v28 = vpop.f32.mrb[93].mxu0 }
 0x1e0   :  { %v1281_v29 = vpop.f32.mrb[94].mxu1  ;;  %v1570_v32 = vpop.f32.mrb[94].mxu0 }
 0x1e1   :  { %2004 = vst.msk [vmem:[%s3195_s3 + $0xb4] sm:$0xf] %vm1958_vm0, %v2298_v24  ;;  %v1568_v30 = vadd.f32 %v1567_v26, %v1279_v25  ;;  %v1282_v31 = vadd.f32 %v2865_v15, %v1281_v29  ;;  %v1283_v33 = vpop.f32.mrb[95].mxu1  ;;  %v1572_v34 = vpop.f32.mrb[95].mxu0 }
 0x1e3   :  { %v1684_v35 = vmax.f32 %v1568_v30, 0.0  ;;  %v1571_v36 = vadd.f32 %v1570_v32, %v1282_v31 }
 0x1e5   :  { %v2299_v37 = vpack.c.bf16 %v1684_v35, %v1684_v35  ;;  %v1685_v38 = vmax.f32 %v1571_v36, 0.0 }
 0x1e6   :  { %v1286_v39 = vpop.f32.mrb[96].mxu1  ;;  %v1575_v42 = vpop.f32.mrb[96].mxu0 }
 0x1e7   :  { %2005 = vst.msk [vmem:[%s3195_s3 + $0xb8] sm:$0xf] %vm1958_vm0, %v2299_v37  ;;  %v2300_v40 = vpack.c.bf16 %v1685_v38, %v1685_v38  ;;  %v1287_v41 = vadd.f32 %v2865_v15, %v1286_v39  ;;  %v1288_v43 = vpop.f32.mrb[97].mxu1  ;;  %v1577_v44 = vpop.f32.mrb[97].mxu0 }
 0x1e8   :  { %v1289_v45 = vpop.f32.mrb[98].mxu1  ;;  %v1578_v48 = vpop.f32.mrb[98].mxu0 }
 0x1e9   :  { %2006 = vst.msk [vmem:[%s3195_s3 + $0xbc] sm:$0xf] %vm1958_vm0, %v2300_v40  ;;  %v1576_v46 = vadd.f32 %v1575_v42, %v1287_v41  ;;  %v1290_v47 = vadd.f32 %v2865_v15, %v1289_v45  ;;  %v1291_v49 = vpop.f32.mrb[99].mxu1  ;;  %v1580_v50 = vpop.f32.mrb[99].mxu0 }
 0x1eb   :  { %v1686_v51 = vmax.f32 %v1576_v46, 0.0  ;;  %v1579_v52 = vadd.f32 %v1578_v48, %v1290_v47 }
 0x1ed   :  { %v2301_v53 = vpack.c.bf16 %v1686_v51, %v1686_v51  ;;  %v1687_v54 = vmax.f32 %v1579_v52, 0.0 }
 0x1ee   :  { %v1294_v55 = vpop.f32.mrb[100].mxu1  ;;  %v1583_v58 = vpop.f32.mrb[100].mxu0 }
 0x1ef   :  { %2007 = vst.msk [vmem:[%s3195_s3 + $0xc0] sm:$0xf] %vm1958_vm0, %v2301_v53  ;;  %v2302_v56 = vpack.c.bf16 %v1687_v54, %v1687_v54  ;;  %v1295_v57 = vadd.f32 %v2865_v15, %v1294_v55  ;;  %v1296_v59 = vpop.f32.mrb[101].mxu1  ;;  %v1585_v60 = vpop.f32.mrb[101].mxu0 }
 0x1f0   :  { %v1297_v61 = vpop.f32.mrb[102].mxu1  ;;  %v1586_v0 = vpop.f32.mrb[102].mxu0 }
 0x1f1   :  { %2008 = vst.msk [vmem:[%s3195_s3 + $0xc4] sm:$0xf] %vm1958_vm0, %v2302_v56  ;;  %v1584_v62 = vadd.f32 %v1583_v58, %v1295_v57  ;;  %v1298_v63 = vadd.f32 %v2865_v15, %v1297_v61  ;;  %v1299_v1 = vpop.f32.mrb[103].mxu1  ;;  %v1588_v2 = vpop.f32.mrb[103].mxu0 }
 0x1f3   :  { %v1688_v3 = vmax.f32 %v1584_v62, 0.0  ;;  %v1587_v4 = vadd.f32 %v1586_v0, %v1298_v63 }
 0x1f5   :  { %v2303_v5 = vpack.c.bf16 %v1688_v3, %v1688_v3  ;;  %v1689_v6 = vmax.f32 %v1587_v4, 0.0 }
 0x1f6   :  { %v1302_v7 = vpop.f32.mrb[104].mxu1  ;;  %v1591_v10 = vpop.f32.mrb[104].mxu0 }
 0x1f7   :  { %2009 = vst.msk [vmem:[%s3195_s3 + $0xc8] sm:$0xf] %vm1958_vm0, %v2303_v5  ;;  %v2304_v8 = vpack.c.bf16 %v1689_v6, %v1689_v6  ;;  %v1303_v9 = vadd.f32 %v2865_v15, %v1302_v7  ;;  %v1304_v11 = vpop.f32.mrb[105].mxu1  ;;  %v1593_v12 = vpop.f32.mrb[105].mxu0 }
 0x1f8   :  { %v1305_v13 = vpop.f32.mrb[106].mxu1  ;;  %v1594_v18 = vpop.f32.mrb[106].mxu0 }
 0x1f9   :  { %2010 = vst.msk [vmem:[%s3195_s3 + $0xcc] sm:$0xf] %vm1958_vm0, %v2304_v8  ;;  %v1592_v14 = vadd.f32 %v1591_v10, %v1303_v9  ;;  %v1306_v17 = vadd.f32 %v3131_v16, %v1305_v13  ;;  %v1307_v19 = vpop.f32.mrb[107].mxu1  ;;  %v1596_v15 = vpop.f32.mrb[107].mxu0 }
 0x1fb   :  { %v1690_v20 = vmax.f32 %v1592_v14, 0.0  ;;  %v1595_v21 = vadd.f32 %v1594_v18, %v1306_v17 }
 0x1fd   :  { %v2305_v22 = vpack.c.bf16 %v1690_v20, %v1690_v20  ;;  %v1691_v23 = vmax.f32 %v1595_v21, 0.0 }
 0x1fe   :  { %v1310_v24 = vpop.f32.mrb[108].mxu1  ;;  %v1599_v27 = vpop.f32.mrb[108].mxu0 }
 0x1ff   :  { %2011 = vst.msk [vmem:[%s3195_s3 + $0xd0] sm:$0xf] %vm1958_vm0, %v2305_v22  ;;  %v2306_v25 = vpack.c.bf16 %v1691_v23, %v1691_v23  ;;  %v1311_v26 = vadd.f32 %v3131_v16, %v1310_v24  ;;  %v1312_v28 = vpop.f32.mrb[109].mxu1  ;;  %v1601_v29 = vpop.f32.mrb[109].mxu0 }
 0x200   :  { %v1313_v30 = vpop.f32.mrb[110].mxu1  ;;  %v1602_v33 = vpop.f32.mrb[110].mxu0 }
 0x201   :  { %2012 = vst.msk [vmem:[%s3195_s3 + $0xd4] sm:$0xf] %vm1958_vm0, %v2306_v25  ;;  %v1600_v31 = vadd.f32 %v1599_v27, %v1311_v26  ;;  %v1314_v32 = vadd.f32 %v3131_v16, %v1313_v30  ;;  %v1315_v34 = vpop.f32.mrb[111].mxu1  ;;  %v1604_v35 = vpop.f32.mrb[111].mxu0 }
 0x203   :  { %v1692_v36 = vmax.f32 %v1600_v31, 0.0  ;;  %v1603_v37 = vadd.f32 %v1602_v33, %v1314_v32 }
 0x205   :  { %v2307_v38 = vpack.c.bf16 %v1692_v36, %v1692_v36  ;;  %v1693_v39 = vmax.f32 %v1603_v37, 0.0 }
 0x206   :  { %v1318_v40 = vpop.f32.mrb[112].mxu1  ;;  %v1607_v43 = vpop.f32.mrb[112].mxu0 }
 0x207   :  { %2013 = vst.msk [vmem:[%s3195_s3 + $0xd8] sm:$0xf] %vm1958_vm0, %v2307_v38  ;;  %v2308_v41 = vpack.c.bf16 %v1693_v39, %v1693_v39  ;;  %v1319_v42 = vadd.f32 %v3131_v16, %v1318_v40  ;;  %v1320_v44 = vpop.f32.mrb[113].mxu1  ;;  %v1609_v45 = vpop.f32.mrb[113].mxu0 }
 0x208   :  { %v1321_v46 = vpop.f32.mrb[114].mxu1  ;;  %v1610_v49 = vpop.f32.mrb[114].mxu0 }
 0x209   :  { %2014 = vst.msk [vmem:[%s3195_s3 + $0xdc] sm:$0xf] %vm1958_vm0, %v2308_v41  ;;  %v1608_v47 = vadd.f32 %v1607_v43, %v1319_v42  ;;  %v1322_v48 = vadd.f32 %v3131_v16, %v1321_v46  ;;  %v1323_v50 = vpop.f32.mrb[115].mxu1  ;;  %v1612_v51 = vpop.f32.mrb[115].mxu0 }
 0x20b   :  { %v1694_v52 = vmax.f32 %v1608_v47, 0.0  ;;  %v1611_v53 = vadd.f32 %v1610_v49, %v1322_v48 }
 0x20d   :  { %v2309_v54 = vpack.c.bf16 %v1694_v52, %v1694_v52  ;;  %v1695_v55 = vmax.f32 %v1611_v53, 0.0 }
 0x20e   :  { %v1326_v56 = vpop.f32.mrb[116].mxu1  ;;  %v1615_v59 = vpop.f32.mrb[116].mxu0 }
 0x20f   :  { %2015 = vst.msk [vmem:[%s3195_s3 + $0xe0] sm:$0xf] %vm1958_vm0, %v2309_v54  ;;  %v2310_v57 = vpack.c.bf16 %v1695_v55, %v1695_v55  ;;  %v1327_v58 = vadd.f32 %v3131_v16, %v1326_v56  ;;  %v1328_v60 = vpop.f32.mrb[117].mxu1  ;;  %v1617_v61 = vpop.f32.mrb[117].mxu0 }
 0x210   :  { %v1329_v62 = vpop.f32.mrb[118].mxu1  ;;  %v1618_v1 = vpop.f32.mrb[118].mxu0 }
 0x211   :  { %2016 = vst.msk [vmem:[%s3195_s3 + $0xe4] sm:$0xf] %vm1958_vm0, %v2310_v57  ;;  %v1616_v63 = vadd.f32 %v1615_v59, %v1327_v58  ;;  %v1330_v0 = vadd.f32 %v3131_v16, %v1329_v62  ;;  %v1331_v2 = vpop.f32.mrb[119].mxu1  ;;  %v1620_v3 = vpop.f32.mrb[119].mxu0 }
 0x213   :  { %v1696_v4 = vmax.f32 %v1616_v63, 0.0  ;;  %v1619_v5 = vadd.f32 %v1618_v1, %v1330_v0 }
 0x215   :  { %v2311_v6 = vpack.c.bf16 %v1696_v4, %v1696_v4  ;;  %v1697_v7 = vmax.f32 %v1619_v5, 0.0 }
 0x216   :  { %v1334_v8 = vpop.f32.mrb[120].mxu1  ;;  %v1623_v11 = vpop.f32.mrb[120].mxu0 }
 0x217   :  { %2017 = vst.msk [vmem:[%s3195_s3 + $0xe8] sm:$0xf] %vm1958_vm0, %v2311_v6  ;;  %v2312_v9 = vpack.c.bf16 %v1697_v7, %v1697_v7  ;;  %v1335_v10 = vadd.f32 %v3131_v16, %v1334_v8  ;;  %v1336_v12 = vpop.f32.mrb[121].mxu1  ;;  %v1625_v13 = vpop.f32.mrb[121].mxu0 }
 0x218   :  { %v1337_v14 = vpop.f32.mrb[122].mxu1  ;;  %v1626_v19 = vpop.f32.mrb[122].mxu0 }
 0x219   :  { %2018 = vst.msk [vmem:[%s3195_s3 + $0xec] sm:$0xf] %vm1958_vm0, %v2312_v9  ;;  %v1624_v17 = vadd.f32 %v1623_v11, %v1335_v10  ;;  %v1338_v18 = vadd.f32 %v3131_v16, %v1337_v14  ;;  %v1339_v15 = vpop.f32.mrb[123].mxu1  ;;  %v1628_v20 = vpop.f32.mrb[123].mxu0 }
 0x21b   :  { %v1698_v21 = vmax.f32 %v1624_v17, 0.0  ;;  %v1627_v22 = vadd.f32 %v1626_v19, %v1338_v18 }
 0x21d   :  { %v2313_v23 = vpack.c.bf16 %v1698_v21, %v1698_v21  ;;  %v1699_v24 = vmax.f32 %v1627_v22, 0.0 }
 0x21e   :  { %v1342_v25 = vpop.f32.mrb[124].mxu1  ;;  %v1631_v28 = vpop.f32.mrb[124].mxu0 }
 0x21f   :  { %2019 = vst.msk [vmem:[%s3195_s3 + $0xf0] sm:$0xf] %vm1958_vm0, %v2313_v23  ;;  %v2314_v26 = vpack.c.bf16 %v1699_v24, %v1699_v24  ;;  %v1343_v27 = vadd.f32 %v3131_v16, %v1342_v25  ;;  %v1344_v29 = vpop.f32.mrb[125].mxu1  ;;  %v1633_v30 = vpop.f32.mrb[125].mxu0 }
 0x220   :  { %v1345_v31 = vpop.f32.mrb[126].mxu1  ;;  %v1634_v34 = vpop.f32.mrb[126].mxu0 }
 0x221   :  { %2020 = vst.msk [vmem:[%s3195_s3 + $0xf4] sm:$0xf] %vm1958_vm0, %v2314_v26  ;;  %v1632_v32 = vadd.f32 %v1631_v28, %v1343_v27  ;;  %v1346_v33 = vadd.f32 %v3131_v16, %v1345_v31  ;;  %v1347_v35 = vpop.f32.mrb[127].mxu1  ;;  %v1636_v36 = vpop.f32.mrb[127].mxu0 }
 0x223   :  { %v1700_v37 = vmax.f32 %v1632_v32, 0.0  ;;  %v1635_v38 = vadd.f32 %v1634_v34, %v1346_v33 }
 0x225   :  { %v2315_v39 = vpack.c.bf16 %v1700_v37, %v1700_v37  ;;  %v1701_v40 = vmax.f32 %v1635_v38, 0.0 }
 0x227   :  { %2021 = vst.msk [vmem:[%s3195_s3 + $0xf8] sm:$0xf] %vm1958_vm0, %v2315_v39  ;;  %v2316_v41 = vpack.c.bf16 %v1701_v40, %v1701_v40 }
 0x229   :  { %2022 = vst.msk [vmem:[%s3195_s3 + $0xfc] sm:$0xf] %vm1958_vm0, %v2316_v41 }
 0x22a   :  { %2027 = vsyncpa [#allocation3], 1 }

</bundles_post_ra>
